<compile_context>
chip_gen: v5e
topology: v5e:2x2
jax: 0.10.0
libtpu: 0.0.40
codegen_flags: <defaults>
</compile_context>

<pallas_src>
import functools
import math

import jax
import jax.numpy as jnp
from jax.experimental import pallas as pl
from jax.experimental.pallas import tpu as pltpu


# ---------------------------------------------------------------------------
# Fused decoder-layer kernel (one grid step = b_blk batch elements, all heads)
# ---------------------------------------------------------------------------

def _decoder_layer_kernel(
    # activations / masks (per-batch-block)
    trg_ref, src_ref, tmask_ref, smask_ref,
    # masked self-attention params
    wqkv1_ref, bqkv1_ref, wo1_ref, bo1_ref, g1_ref, be1_ref,
    # cross-attention params
    wq2_ref, bq2_ref, wkv2_ref, bkv2_ref, wo2_ref, bo2_ref, g2_ref, be2_ref,
    # position-wise FFN params
    wf1_ref, bf1_ref, wf2_ref, bf2_ref, g3_ref, be3_ref,
    # outputs
    out_ref, score_ref,
    *, head_n, hidden_dim, b_blk, s_trg, s_src,
):
    H, D = head_n, hidden_dim
    Dh = D // H
    scale = 1.0 / math.sqrt(Dh)
    Mt = b_blk * s_trg          # flattened target rows fed to the MXU
    Ms = b_blk * s_src          # flattened source rows fed to the MXU

    # f32 copy for residual / LayerNorm path; bf16 copies only for MXU feeds.
    x = trg_ref[...].astype(jnp.float32).reshape(Mt, D)
    src_b = src_ref[...].astype(jnp.bfloat16).reshape(Ms, D)

    def proj(a_bf16, w_ref, b_ref):
        # bf16 MXU feed, f32 accumulation, f32 bias add.
        return jnp.dot(a_bf16, w_ref[...],
                       preferred_element_type=jnp.float32) + b_ref[...]

    def layer_norm(z, g_ref, b_ref):
        mu = jnp.mean(z, axis=-1, keepdims=True)
        d = z - mu
        var = jnp.mean(d * d, axis=-1, keepdims=True)
        return d * jax.lax.rsqrt(var + 1e-5) * g_ref[...] + b_ref[...]

    def split_heads(t, S):
        # (b_blk*S, D) -> (b_blk*H, S, Dh), bf16 for the MXU.
        return (t.reshape(b_blk, S, H, Dh)
                 .transpose(0, 2, 1, 3)
                 .reshape(b_blk * H, S, Dh)
                 .astype(jnp.bfloat16))

    def merge_heads(t, S):
        # (b_blk*H, S, Dh) -> (b_blk*S, D)
        return (t.reshape(b_blk, H, S, Dh)
                 .transpose(0, 2, 1, 3)
                 .reshape(b_blk * S, D))

    def mh_attention(q, k, v, mask_add, Sq, Sk):
        # q: (b_blk*Sq, D), k/v: (b_blk*Sk, D); mask_add: (b_blk, Sq|1, Sk) additive.
        qh, kh, vh = split_heads(q, Sq), split_heads(k, Sk), split_heads(v, Sk)
        sc = jnp.einsum("gqd,gkd->gqk", qh, kh,
                        preferred_element_type=jnp.float32) * scale
        sc = (sc.reshape(b_blk, H, Sq, Sk) + mask_add[:, None]
              ).reshape(b_blk * H, Sq, Sk)
        sc = sc - jnp.max(sc, axis=-1, keepdims=True)
        p = jnp.exp(sc)
        p = p / jnp.sum(p, axis=-1, keepdims=True)    # exact softmax (rows sum to 1)
        ctx = jnp.einsum("gqk,gkd->gqd", p.astype(jnp.bfloat16), vh,
                         preferred_element_type=jnp.float32)
        return merge_heads(ctx, Sq), p

    # --- 1) masked self-attention + residual & LayerNorm (probs discarded) ---
    xb = x.astype(jnp.bfloat16)
    qkv = proj(xb, wqkv1_ref, bqkv1_ref)                       # (Mt, 3D)
    ctx, _ = mh_attention(qkv[:, 0:D], qkv[:, D:2 * D], qkv[:, 2 * D:3 * D],
                          tmask_ref[...], s_trg, s_trg)
    x = layer_norm(x + proj(ctx.astype(jnp.bfloat16), wo1_ref, bo1_ref),
                   g1_ref, be1_ref)

    # --- 2) cross attention + residual & LayerNorm (probs returned) ---
    xb = x.astype(jnp.bfloat16)
    q2 = proj(xb, wq2_ref, bq2_ref)                            # (Mt, D)
    kv2 = proj(src_b, wkv2_ref, bkv2_ref)                      # (Ms, 2D)
    ctx, p = mh_attention(q2, kv2[:, 0:D], kv2[:, D:2 * D],
                          smask_ref[...], s_trg, s_src)
    # Single lane-denser store: (b_blk*H, St, Ss) -> (b_blk, St, H*Ss).
    score_ref[...] = (p.reshape(b_blk, H, s_trg, s_src)
                        .transpose(0, 2, 1, 3)
                        .reshape(b_blk, s_trg, H * s_src)).astype(score_ref.dtype)
    x = layer_norm(x + proj(ctx.astype(jnp.bfloat16), wo2_ref, bo2_ref),
                   g2_ref, be2_ref)

    # --- 3) position-wise FFN + residual & LayerNorm ---
    xb = x.astype(jnp.bfloat16)
    h1 = jnp.maximum(proj(xb, wf1_ref, bf1_ref), 0.0)
    ff = proj(h1.astype(jnp.bfloat16), wf2_ref, bf2_ref)
    x = layer_norm(x + ff, g3_ref, be3_ref)

    out_ref[...] = x.reshape(b_blk, s_trg, D).astype(out_ref.dtype)


# ---------------------------------------------------------------------------
# Wrapper: weight fusion / casts + single pallas_call
# ---------------------------------------------------------------------------

@functools.partial(jax.jit, static_argnames=("head_n", "b_blk"))
def decoder_layer(params, src, trg, src_mask, trg_mask, head_n, b_blk=1):
    B, S_trg, D = trg.shape
    S_src = src.shape[1]
    F = params["ffn"]["w1"].shape[1]
    assert B % b_blk == 0

    pm, pa, pf = params["masked_attention"], params["attention"], params["ffn"]
    bf16 = lambda w: w.astype(jnp.bfloat16)

    # Fused QKV for self-attention, fused KV for cross-attention.
    wqkv1 = bf16(jnp.concatenate([pm["wq"], pm["wk"], pm["wv"]], axis=1))
    bqkv1 = jnp.concatenate([pm["bq"], pm["bk"], pm["bv"]]).reshape(1, 3 * D)
    wo1, bo1 = bf16(pm["wo"]), pm["bo"].reshape(1, D)

    wq2, bq2 = bf16(pa["wq"]), pa["bq"].reshape(1, D)
    wkv2 = bf16(jnp.concatenate([pa["wk"], pa["wv"]], axis=1))
    bkv2 = jnp.concatenate([pa["bk"], pa["bv"]]).reshape(1, 2 * D)
    wo2, bo2 = bf16(pa["wo"]), pa["bo"].reshape(1, D)

    wf1, bf1 = bf16(pf["w1"]), pf["b1"].reshape(1, F)
    wf2, bf2 = bf16(pf["w2"]), pf["b2"].reshape(1, D)

    g1, be1 = params["rn1"]["gamma"].reshape(1, D), params["rn1"]["beta"].reshape(1, D)
    g2, be2 = params["rn2"]["gamma"].reshape(1, D), params["rn2"]["beta"].reshape(1, D)
    g3, be3 = params["rn3"]["gamma"].reshape(1, D), params["rn3"]["beta"].reshape(1, D)

    # Additive masks (0 = visible, -1e9 = masked).  trg mask kept full (B,St,St)
    # (arbitrary mask allowed); src mask compacted to a key-padding row (B,1,Ss).
    tmask_add = (jnp.broadcast_to(trg_mask.astype(jnp.float32),
                                  (B, 1, S_trg, S_trg)).reshape(B, S_trg, S_trg)
                 - 1.0) * 1e9
    smask_add = (jnp.broadcast_to(src_mask.astype(jnp.float32),
                                  (B, 1, 1, S_src)).reshape(B, 1, S_src)
                 - 1.0) * 1e9

    shared = lambda shape: pl.BlockSpec(shape, lambda b: (0, 0))          # weights
    per_b = lambda s1, s2: pl.BlockSpec((b_blk, s1, s2), lambda b: (b, 0, 0))

    kernel = functools.partial(_decoder_layer_kernel, head_n=head_n,
                               hidden_dim=D, b_blk=b_blk,
                               s_trg=S_trg, s_src=S_src)

    out, score_flat = pl.pallas_call(
        kernel,
        out_shape=(
            jax.ShapeDtypeStruct((B, S_trg, D), trg.dtype),
            jax.ShapeDtypeStruct((B, S_trg, head_n * S_src), jnp.float32),
        ),
        grid=(B // b_blk,),
        in_specs=[
            per_b(S_trg, D),                 # trg
            per_b(S_src, D),                 # src
            per_b(S_trg, S_trg),             # additive trg mask
            per_b(1, S_src),                 # additive src key mask
            shared((D, 3 * D)), shared((1, 3 * D)),   # wqkv1, bqkv1
            shared((D, D)), shared((1, D)),           # wo1, bo1
            shared((1, D)), shared((1, D)),           # gamma1, beta1
            shared((D, D)), shared((1, D)),           # wq2, bq2
            shared((D, 2 * D)), shared((1, 2 * D)),   # wkv2, bkv2
            shared((D, D)), shared((1, D)),           # wo2, bo2
            shared((1, D)), shared((1, D)),           # gamma2, beta2
            shared((D, F)), shared((1, F)),           # wf1, bf1
            shared((F, D)), shared((1, D)),           # wf2, bf2
            shared((1, D)), shared((1, D)),           # gamma3, beta3
        ],
        out_specs=[per_b(S_trg, D), per_b(S_trg, head_n * S_src)],
        compiler_params=pltpu.CompilerParams(
            dimension_semantics=("parallel",),
            vmem_limit_bytes=32 * 1024 * 1024),
    )(trg, src, tmask_add, smask_add,
      wqkv1, bqkv1, wo1, bo1, g1, be1,
      wq2, bq2, wkv2, bkv2, wo2, bo2, g2, be2,
      wf1, bf1, wf2, bf2, g3, be3)

    # Layout plumbing back to the PyTorch score convention (B, H, S_trg, S_src).
    score = score_flat.reshape(B, S_trg, head_n, S_src).transpose(0, 2, 1, 3)
    return out, score


# ---------------------------------------------------------------------------
# Pure-JAX f32 reference (eval-mode dropout = identity)
# ---------------------------------------------------------------------------

def decoder_layer_reference(params, src, trg, src_mask, trg_mask, head_n):
    B, S_t, D = trg.shape
    S_s = src.shape[1]
    Dh = D // head_n

    def linear(x, w, b):
        return x @ w + b

    def split(x, S):
        return x.reshape(B, S, head_n, Dh).transpose(0, 2, 1, 3)

    def mha(p, q_in, k_in, v_in, mask_add):
        Sq, Sk = q_in.shape[1], k_in.shape[1]
        q = split(linear(q_in, p["wq"], p["bq"]), Sq)
        k = split(linear(k_in, p["wk"], p["bk"]), Sk)
        v = split(linear(v_in, p["wv"], p["bv"]), Sk)
        sc = jnp.einsum("bhqd,bhkd->bhqk", q, k) / math.sqrt(Dh) + mask_add
        sc = jax.nn.softmax(sc, axis=-1)
        ctx = jnp.einsum("bhqk,bhkd->bhqd", sc, v).transpose(0, 2, 1, 3).reshape(B, Sq, D)
        return linear(ctx, p["wo"], p["bo"]), sc

    def ln(x, p):
        mu = x.mean(-1, keepdims=True)
        var = ((x - mu) ** 2).mean(-1, keepdims=True)
        return (x - mu) / jnp.sqrt(var + 1e-5) * p["gamma"] + p["beta"]

    tmask = (jnp.broadcast_to(trg_mask.astype(jnp.float32), (B, 1, S_t, S_t)) - 1.0) * 1e9
    smask = (jnp.broadcast_to(src_mask.astype(jnp.float32), (B, 1, 1, S_s)) - 1.0) * 1e9

    a1, _ = mha(params["masked_attention"], trg, trg, trg, tmask)
    x = ln(trg + a1, params["rn1"])
    a2, score = mha(params["attention"], x, src, src, smask)
    x = ln(x + a2, params["rn2"])
    h = jax.nn.relu(linear(x, params["ffn"]["w1"], params["ffn"]["b1"]))
    ff = linear(h, params["ffn"]["w2"], params["ffn"]["b2"])
    x = ln(x + ff, params["rn3"])
    return x, score


# ---------------------------------------------------------------------------
# Deterministic parameter init
# ---------------------------------------------------------------------------

def init_params(key, hidden_dim, ffn_dim):
    ks = iter(jax.random.split(key, 16))

    def lin(k, din, dout):
        return (0.02 * jax.random.normal(k, (din, dout), jnp.float32),
                jnp.zeros((dout,), jnp.float32))

    def mha_params(k):
        k1, k2, k3, k4 = jax.random.split(k, 4)
        wq, bq = lin(k1, hidden_dim, hidden_dim)
        wk, bk = lin(k2, hidden_dim, hidden_dim)
        wv, bv = lin(k3, hidden_dim, hidden_dim)
        wo, bo = lin(k4, hidden_dim, hidden_dim)
        return dict(wq=wq, bq=bq, wk=wk, bk=bk, wv=wv, bv=bv, wo=wo, bo=bo)

    def norm_params():
        return dict(gamma=jnp.ones((hidden_dim,), jnp.float32),
                    beta=jnp.zeros((hidden_dim,), jnp.float32))

    w1, b1 = lin(next(ks), hidden_dim, ffn_dim)
    w2, b2 = lin(next(ks), ffn_dim, hidden_dim)
    return dict(
        masked_attention=mha_params(next(ks)),
        rn1=norm_params(),
        attention=mha_params(next(ks)),
        rn2=norm_params(),
        ffn=dict(w1=w1, b1=b1, w2=w2, b2=b2),
        rn3=norm_params(),
    )


# ---------------------------------------------------------------------------
# Main
# ---------------------------------------------------------------------------

if __name__ == "__main__":
    head_n = 4
    hidden_dim = 32
    ffn_dim = 64
    B, S_src, S_trg = 2, 8, 8

    root = jax.random.PRNGKey(0)
    kp, ksrc, ktrg = jax.random.split(root, 3)

    params = init_params(kp, hidden_dim, ffn_dim)
    src = jax.random.normal(ksrc, (B, S_src, hidden_dim), jnp.float32)
    trg = jax.random.normal(ktrg, (B, S_trg, hidden_dim), jnp.float32)

    # src_mask: (B, 1, 1, S_src) all-visible; trg_mask: (B, 1, S_trg, S_trg) causal
    src_mask = jnp.ones((B, 1, 1, S_src), jnp.float32)
    causal = jnp.tril(jnp.ones((S_trg, S_trg), jnp.float32))
    trg_mask = jnp.broadcast_to(causal, (B, 1, S_trg, S_trg))

    out, score = decoder_layer(params, src, trg, src_mask, trg_mask, head_n=head_n)
    out = jax.block_until_ready(out)
    score = jax.block_until_ready(score)

    ref_out, ref_score = decoder_layer_reference(params, src, trg, src_mask,
                                                 trg_mask, head_n)

    assert out.shape == (B, S_trg, hidden_dim)
    assert score.shape == (B, head_n, S_trg, S_src)
    assert bool(jnp.all(jnp.isfinite(out))) and bool(jnp.all(jnp.isfinite(score)))
    # exact softmax normalization for the returned cross-attention probabilities
    assert bool(jnp.all(jnp.abs(jnp.sum(score, axis=-1) - 1.0) < 1e-3))
    # bf16 MXU feeds -> loose tolerance vs the f32 reference
    assert bool(jnp.allclose(out, ref_out, atol=5e-2, rtol=5e-2))
    assert bool(jnp.allclose(score, ref_score, atol=2e-2, rtol=2e-2))
    print("KERNEL_OK")
</pallas_src>

<mosaic_0001>
module attributes {stable_mosaic.version = 11 : i64} {
  func.func @_decoder_layer_kernel(%arg0: i32, %arg1: memref<1x8x32xf32, #tpu.memory_space<vmem>>, %arg2: memref<1x8x32xf32, #tpu.memory_space<vmem>>, %arg3: memref<1x8x8xf32, #tpu.memory_space<vmem>>, %arg4: memref<1x1x8xf32, #tpu.memory_space<vmem>>, %arg5: memref<32x96xbf16, #tpu.memory_space<vmem>>, %arg6: memref<1x96xf32, #tpu.memory_space<vmem>>, %arg7: memref<32x32xbf16, #tpu.memory_space<vmem>>, %arg8: memref<1x32xf32, #tpu.memory_space<vmem>>, %arg9: memref<1x32xf32, #tpu.memory_space<vmem>>, %arg10: memref<1x32xf32, #tpu.memory_space<vmem>>, %arg11: memref<32x32xbf16, #tpu.memory_space<vmem>>, %arg12: memref<1x32xf32, #tpu.memory_space<vmem>>, %arg13: memref<32x64xbf16, #tpu.memory_space<vmem>>, %arg14: memref<1x64xf32, #tpu.memory_space<vmem>>, %arg15: memref<32x32xbf16, #tpu.memory_space<vmem>>, %arg16: memref<1x32xf32, #tpu.memory_space<vmem>>, %arg17: memref<1x32xf32, #tpu.memory_space<vmem>>, %arg18: memref<1x32xf32, #tpu.memory_space<vmem>>, %arg19: memref<32x64xbf16, #tpu.memory_space<vmem>>, %arg20: memref<1x64xf32, #tpu.memory_space<vmem>>, %arg21: memref<64x32xbf16, #tpu.memory_space<vmem>>, %arg22: memref<1x32xf32, #tpu.memory_space<vmem>>, %arg23: memref<1x32xf32, #tpu.memory_space<vmem>>, %arg24: memref<1x32xf32, #tpu.memory_space<vmem>>, %arg25: memref<1x8x32xf32, #tpu.memory_space<vmem>>, %arg26: memref<1x8x32xf32, #tpu.memory_space<vmem>>) attributes {dimension_semantics = [#tpu.dimension_semantics<parallel>], iteration_bounds = array<i64: 2>, scalar_prefetch = 0 : i64, scratch_operands = 0 : i64, tpu.core_type = #tpu.core_type<tc>, window_params = [{transform_indices = @transform_0, window_bounds = array<i64: 1, 8, 32>}, {transform_indices = @transform_1, window_bounds = array<i64: 1, 8, 32>}, {transform_indices = @transform_2, window_bounds = array<i64: 1, 8, 8>}, {transform_indices = @transform_3, window_bounds = array<i64: 1, 1, 8>}, {pipeline_mode = #tpu.pipeline_mode<synchronous>, transform_indices = @transform_4, window_bounds = array<i64: 32, 96>}, {pipeline_mode = #tpu.pipeline_mode<synchronous>, transform_indices = @transform_5, window_bounds = array<i64: 1, 96>}, {pipeline_mode = #tpu.pipeline_mode<synchronous>, transform_indices = @transform_6, window_bounds = array<i64: 32, 32>}, {pipeline_mode = #tpu.pipeline_mode<synchronous>, transform_indices = @transform_7, window_bounds = array<i64: 1, 32>}, {pipeline_mode = #tpu.pipeline_mode<synchronous>, transform_indices = @transform_8, window_bounds = array<i64: 1, 32>}, {pipeline_mode = #tpu.pipeline_mode<synchronous>, transform_indices = @transform_9, window_bounds = array<i64: 1, 32>}, {pipeline_mode = #tpu.pipeline_mode<synchronous>, transform_indices = @transform_10, window_bounds = array<i64: 32, 32>}, {pipeline_mode = #tpu.pipeline_mode<synchronous>, transform_indices = @transform_11, window_bounds = array<i64: 1, 32>}, {pipeline_mode = #tpu.pipeline_mode<synchronous>, transform_indices = @transform_12, window_bounds = array<i64: 32, 64>}, {pipeline_mode = #tpu.pipeline_mode<synchronous>, transform_indices = @transform_13, window_bounds = array<i64: 1, 64>}, {pipeline_mode = #tpu.pipeline_mode<synchronous>, transform_indices = @transform_14, window_bounds = array<i64: 32, 32>}, {pipeline_mode = #tpu.pipeline_mode<synchronous>, transform_indices = @transform_15, window_bounds = array<i64: 1, 32>}, {pipeline_mode = #tpu.pipeline_mode<synchronous>, transform_indices = @transform_16, window_bounds = array<i64: 1, 32>}, {pipeline_mode = #tpu.pipeline_mode<synchronous>, transform_indices = @transform_17, window_bounds = array<i64: 1, 32>}, {pipeline_mode = #tpu.pipeline_mode<synchronous>, transform_indices = @transform_18, window_bounds = array<i64: 32, 64>}, {pipeline_mode = #tpu.pipeline_mode<synchronous>, transform_indices = @transform_19, window_bounds = array<i64: 1, 64>}, {pipeline_mode = #tpu.pipeline_mode<synchronous>, transform_indices = @transform_20, window_bounds = array<i64: 64, 32>}, {pipeline_mode = #tpu.pipeline_mode<synchronous>, transform_indices = @transform_21, window_bounds = array<i64: 1, 32>}, {pipeline_mode = #tpu.pipeline_mode<synchronous>, transform_indices = @transform_22, window_bounds = array<i64: 1, 32>}, {pipeline_mode = #tpu.pipeline_mode<synchronous>, transform_indices = @transform_23, window_bounds = array<i64: 1, 32>}, {transform_indices = @transform_24, window_bounds = array<i64: 1, 8, 32>}, {transform_indices = @transform_25, window_bounds = array<i64: 1, 8, 32>}]} {
    %c0 = arith.constant 0 : index
    %c0_0 = arith.constant 0 : index
    %c0_1 = arith.constant 0 : index
    %0 = vector.load %arg1[%c0, %c0_0, %c0_1] : memref<1x8x32xf32, #tpu.memory_space<vmem>>, vector<1x8x32xf32>
    %1 = vector.shape_cast %0 : vector<1x8x32xf32> to vector<8x32xf32>
    %c0_2 = arith.constant 0 : index
    %c0_3 = arith.constant 0 : index
    %c0_4 = arith.constant 0 : index
    %2 = vector.load %arg2[%c0_2, %c0_3, %c0_4] : memref<1x8x32xf32, #tpu.memory_space<vmem>>, vector<1x8x32xf32>
    %3 = arith.truncf %2 : vector<1x8x32xf32> to vector<1x8x32xbf16>
    %4 = vector.shape_cast %3 : vector<1x8x32xbf16> to vector<8x32xbf16>
    %5 = arith.truncf %1 : vector<8x32xf32> to vector<8x32xbf16>
    %c0_5 = arith.constant 0 : index
    %c0_6 = arith.constant 0 : index
    %6 = vector.load %arg5[%c0_5, %c0_6] : memref<32x96xbf16, #tpu.memory_space<vmem>>, vector<32x96xbf16>
    %cst = arith.constant dense<0.000000e+00> : vector<8x96xf32>
    %7 = tpu.matmul %5, %6, %cst {dimension_numbers = #tpu.dot_dimension_numbers<[1], [0], [0], [1], [0, 0, 1, 1], [], []>} : vector<8x32xbf16>, vector<32x96xbf16>, vector<8x96xf32> -> vector<8x96xf32>
    %c0_7 = arith.constant 0 : index
    %c0_8 = arith.constant 0 : index
    %8 = vector.load %arg6[%c0_7, %c0_8] : memref<1x96xf32, #tpu.memory_space<vmem>>, vector<1x96xf32>
    %9 = vector.broadcast %8 : vector<1x96xf32> to vector<8x96xf32>
    %10 = arith.addf %7, %9 : vector<8x96xf32>
    %11 = vector.extract_strided_slice %10 {offsets = [0, 0], sizes = [8, 32], strides = [1, 1]} : vector<8x96xf32> to vector<8x32xf32>
    %12 = vector.extract_strided_slice %10 {offsets = [0, 32], sizes = [8, 32], strides = [1, 1]} : vector<8x96xf32> to vector<8x32xf32>
    %13 = vector.extract_strided_slice %10 {offsets = [0, 64], sizes = [8, 32], strides = [1, 1]} : vector<8x96xf32> to vector<8x32xf32>
    %c0_9 = arith.constant 0 : index
    %c0_10 = arith.constant 0 : index
    %c0_11 = arith.constant 0 : index
    %14 = vector.load %arg3[%c0_9, %c0_10, %c0_11] : memref<1x8x8xf32, #tpu.memory_space<vmem>>, vector<1x8x8xf32>
    %15 = vector.shape_cast %11 : vector<8x32xf32> to vector<1x8x4x8xf32>
    %16 = tpu.transpose %15, [0, 2, 1, 3] : vector<1x8x4x8xf32> -> vector<1x4x8x8xf32>
    %17 = vector.shape_cast %16 : vector<1x4x8x8xf32> to vector<4x8x8xf32>
    %18 = arith.truncf %17 : vector<4x8x8xf32> to vector<4x8x8xbf16>
    %19 = vector.shape_cast %12 : vector<8x32xf32> to vector<1x8x4x8xf32>
    %20 = tpu.transpose %19, [0, 2, 1, 3] : vector<1x8x4x8xf32> -> vector<1x4x8x8xf32>
    %21 = vector.shape_cast %20 : vector<1x4x8x8xf32> to vector<4x8x8xf32>
    %22 = arith.truncf %21 : vector<4x8x8xf32> to vector<4x8x8xbf16>
    %23 = vector.shape_cast %13 : vector<8x32xf32> to vector<1x8x4x8xf32>
    %24 = tpu.transpose %23, [0, 2, 1, 3] : vector<1x8x4x8xf32> -> vector<1x4x8x8xf32>
    %25 = vector.shape_cast %24 : vector<1x4x8x8xf32> to vector<4x8x8xf32>
    %26 = arith.truncf %25 : vector<4x8x8xf32> to vector<4x8x8xbf16>
    "tpu.trace_start"() <{level = 10 : i32, message = "gqd,gkd->gqk"}> : () -> ()
    %cst_12 = arith.constant dense<0.000000e+00> : vector<4x8x8xf32>
    %27 = tpu.matmul %18, %22, %cst_12 {dimension_numbers = #tpu.dot_dimension_numbers<[2], [2], [1], [1], [0, 0, 0, 1, 1, 1], [0], [0]>} : vector<4x8x8xbf16>, vector<4x8x8xbf16>, vector<4x8x8xf32> -> vector<4x8x8xf32>
    "tpu.trace_stop"() : () -> ()
    %cst_13 = arith.constant 0.353553385 : f32
    %28 = vector.broadcast %cst_13 : f32 to vector<4x8x8xf32>
    %29 = arith.mulf %27, %28 : vector<4x8x8xf32>
    %30 = vector.shape_cast %29 : vector<4x8x8xf32> to vector<1x4x8x8xf32>
    %31 = vector.shape_cast %14 : vector<1x8x8xf32> to vector<1x1x8x8xf32>
    %32 = vector.broadcast %31 : vector<1x1x8x8xf32> to vector<1x4x8x8xf32>
    %33 = arith.addf %30, %32 : vector<1x4x8x8xf32>
    %34 = vector.shape_cast %33 : vector<1x4x8x8xf32> to vector<4x8x8xf32>
    %cst_14 = arith.constant dense<0xFF800000> : vector<4x8xf32>
    %35 = vector.multi_reduction <maximumf>, %34, %cst_14 [2] : vector<4x8x8xf32> to vector<4x8xf32>
    %36 = vector.shape_cast %35 : vector<4x8xf32> to vector<4x8x1xf32>
    %37 = vector.broadcast %36 : vector<4x8x1xf32> to vector<4x8x8xf32>
    %38 = arith.subf %34, %37 : vector<4x8x8xf32>
    %39 = math.exp %38 : vector<4x8x8xf32>
    %cst_15 = arith.constant dense<0.000000e+00> : vector<4x8xf32>
    %40 = vector.multi_reduction <add>, %39, %cst_15 [2] : vector<4x8x8xf32> to vector<4x8xf32>
    %41 = vector.shape_cast %40 : vector<4x8xf32> to vector<4x8x1xf32>
    %42 = vector.broadcast %41 : vector<4x8x1xf32> to vector<4x8x8xf32>
    %43 = arith.divf %39, %42 : vector<4x8x8xf32>
    %44 = arith.truncf %43 : vector<4x8x8xf32> to vector<4x8x8xbf16>
    "tpu.trace_start"() <{level = 10 : i32, message = "gqk,gkd->gqd"}> : () -> ()
    %cst_16 = arith.constant dense<0.000000e+00> : vector<4x8x8xf32>
    %45 = tpu.matmul %44, %26, %cst_16 {dimension_numbers = #tpu.dot_dimension_numbers<[2], [1], [1], [2], [0, 0, 0, 1, 1, 2], [0], [0]>} : vector<4x8x8xbf16>, vector<4x8x8xbf16>, vector<4x8x8xf32> -> vector<4x8x8xf32>
    "tpu.trace_stop"() : () -> ()
    %46 = vector.shape_cast %45 : vector<4x8x8xf32> to vector<1x4x8x8xf32>
    %47 = tpu.transpose %46, [0, 2, 1, 3] : vector<1x4x8x8xf32> -> vector<1x8x4x8xf32>
    %48 = vector.shape_cast %47 : vector<1x8x4x8xf32> to vector<8x32xf32>
    %49 = arith.truncf %48 : vector<8x32xf32> to vector<8x32xbf16>
    %c0_17 = arith.constant 0 : index
    %c0_18 = arith.constant 0 : index
    %50 = vector.load %arg7[%c0_17, %c0_18] : memref<32x32xbf16, #tpu.memory_space<vmem>>, vector<32x32xbf16>
    %cst_19 = arith.constant dense<0.000000e+00> : vector<8x32xf32>
    %51 = tpu.matmul %49, %50, %cst_19 {dimension_numbers = #tpu.dot_dimension_numbers<[1], [0], [0], [1], [0, 0, 1, 1], [], []>} : vector<8x32xbf16>, vector<32x32xbf16>, vector<8x32xf32> -> vector<8x32xf32>
    %c0_20 = arith.constant 0 : index
    %c0_21 = arith.constant 0 : index
    %52 = vector.load %arg8[%c0_20, %c0_21] : memref<1x32xf32, #tpu.memory_space<vmem>>, vector<1x32xf32>
    %53 = vector.broadcast %52 : vector<1x32xf32> to vector<8x32xf32>
    %54 = arith.addf %51, %53 : vector<8x32xf32>
    %55 = arith.addf %1, %54 : vector<8x32xf32>
    %cst_22 = arith.constant dense<0.000000e+00> : vector<8xf32>
    %56 = vector.multi_reduction <add>, %55, %cst_22 [1] : vector<8x32xf32> to vector<8xf32>
    %57 = vector.shape_cast %56 : vector<8xf32> to vector<8x1xf32>
    %cst_23 = arith.constant 3.200000e+01 : f32
    %58 = vector.broadcast %cst_23 : f32 to vector<8x1xf32>
    %59 = arith.divf %57, %58 : vector<8x1xf32>
    %60 = vector.broadcast %59 : vector<8x1xf32> to vector<8x32xf32>
    %61 = arith.subf %55, %60 : vector<8x32xf32>
    %62 = arith.mulf %61, %61 : vector<8x32xf32>
    %cst_24 = arith.constant dense<0.000000e+00> : vector<8xf32>
    %63 = vector.multi_reduction <add>, %62, %cst_24 [1] : vector<8x32xf32> to vector<8xf32>
    %64 = vector.shape_cast %63 : vector<8xf32> to vector<8x1xf32>
    %cst_25 = arith.constant 3.200000e+01 : f32
    %65 = vector.broadcast %cst_25 : f32 to vector<8x1xf32>
    %66 = arith.divf %64, %65 : vector<8x1xf32>
    %cst_26 = arith.constant 9.99999974E-6 : f32
    %67 = vector.broadcast %cst_26 : f32 to vector<8x1xf32>
    %68 = arith.addf %66, %67 : vector<8x1xf32>
    %69 = math.rsqrt %68 : vector<8x1xf32>
    %70 = vector.broadcast %69 : vector<8x1xf32> to vector<8x32xf32>
    %71 = arith.mulf %61, %70 : vector<8x32xf32>
    %c0_27 = arith.constant 0 : index
    %c0_28 = arith.constant 0 : index
    %72 = vector.load %arg9[%c0_27, %c0_28] : memref<1x32xf32, #tpu.memory_space<vmem>>, vector<1x32xf32>
    %73 = vector.broadcast %72 : vector<1x32xf32> to vector<8x32xf32>
    %74 = arith.mulf %71, %73 : vector<8x32xf32>
    %c0_29 = arith.constant 0 : index
    %c0_30 = arith.constant 0 : index
    %75 = vector.load %arg10[%c0_29, %c0_30] : memref<1x32xf32, #tpu.memory_space<vmem>>, vector<1x32xf32>
    %76 = vector.broadcast %75 : vector<1x32xf32> to vector<8x32xf32>
    %77 = arith.addf %74, %76 : vector<8x32xf32>
    %78 = arith.truncf %77 : vector<8x32xf32> to vector<8x32xbf16>
    %c0_31 = arith.constant 0 : index
    %c0_32 = arith.constant 0 : index
    %79 = vector.load %arg11[%c0_31, %c0_32] : memref<32x32xbf16, #tpu.memory_space<vmem>>, vector<32x32xbf16>
    %cst_33 = arith.constant dense<0.000000e+00> : vector<8x32xf32>
    %80 = tpu.matmul %78, %79, %cst_33 {dimension_numbers = #tpu.dot_dimension_numbers<[1], [0], [0], [1], [0, 0, 1, 1], [], []>} : vector<8x32xbf16>, vector<32x32xbf16>, vector<8x32xf32> -> vector<8x32xf32>
    %c0_34 = arith.constant 0 : index
    %c0_35 = arith.constant 0 : index
    %81 = vector.load %arg12[%c0_34, %c0_35] : memref<1x32xf32, #tpu.memory_space<vmem>>, vector<1x32xf32>
    %82 = vector.broadcast %81 : vector<1x32xf32> to vector<8x32xf32>
    %83 = arith.addf %80, %82 : vector<8x32xf32>
    %c0_36 = arith.constant 0 : index
    %c0_37 = arith.constant 0 : index
    %84 = vector.load %arg13[%c0_36, %c0_37] : memref<32x64xbf16, #tpu.memory_space<vmem>>, vector<32x64xbf16>
    %cst_38 = arith.constant dense<0.000000e+00> : vector<8x64xf32>
    %85 = tpu.matmul %4, %84, %cst_38 {dimension_numbers = #tpu.dot_dimension_numbers<[1], [0], [0], [1], [0, 0, 1, 1], [], []>} : vector<8x32xbf16>, vector<32x64xbf16>, vector<8x64xf32> -> vector<8x64xf32>
    %c0_39 = arith.constant 0 : index
    %c0_40 = arith.constant 0 : index
    %86 = vector.load %arg14[%c0_39, %c0_40] : memref<1x64xf32, #tpu.memory_space<vmem>>, vector<1x64xf32>
    %87 = vector.broadcast %86 : vector<1x64xf32> to vector<8x64xf32>
    %88 = arith.addf %85, %87 : vector<8x64xf32>
    %89 = vector.extract_strided_slice %88 {offsets = [0, 0], sizes = [8, 32], strides = [1, 1]} : vector<8x64xf32> to vector<8x32xf32>
    %90 = vector.extract_strided_slice %88 {offsets = [0, 32], sizes = [8, 32], strides = [1, 1]} : vector<8x64xf32> to vector<8x32xf32>
    %c0_41 = arith.constant 0 : index
    %c0_42 = arith.constant 0 : index
    %c0_43 = arith.constant 0 : index
    %91 = vector.load %arg4[%c0_41, %c0_42, %c0_43] : memref<1x1x8xf32, #tpu.memory_space<vmem>>, vector<1x1x8xf32>
    %92 = vector.shape_cast %83 : vector<8x32xf32> to vector<1x8x4x8xf32>
    %93 = tpu.transpose %92, [0, 2, 1, 3] : vector<1x8x4x8xf32> -> vector<1x4x8x8xf32>
    %94 = vector.shape_cast %93 : vector<1x4x8x8xf32> to vector<4x8x8xf32>
    %95 = arith.truncf %94 : vector<4x8x8xf32> to vector<4x8x8xbf16>
    %96 = vector.shape_cast %89 : vector<8x32xf32> to vector<1x8x4x8xf32>
    %97 = tpu.transpose %96, [0, 2, 1, 3] : vector<1x8x4x8xf32> -> vector<1x4x8x8xf32>
    %98 = vector.shape_cast %97 : vector<1x4x8x8xf32> to vector<4x8x8xf32>
    %99 = arith.truncf %98 : vector<4x8x8xf32> to vector<4x8x8xbf16>
    %100 = vector.shape_cast %90 : vector<8x32xf32> to vector<1x8x4x8xf32>
    %101 = tpu.transpose %100, [0, 2, 1, 3] : vector<1x8x4x8xf32> -> vector<1x4x8x8xf32>
    %102 = vector.shape_cast %101 : vector<1x4x8x8xf32> to vector<4x8x8xf32>
    %103 = arith.truncf %102 : vector<4x8x8xf32> to vector<4x8x8xbf16>
    "tpu.trace_start"() <{level = 10 : i32, message = "gqd,gkd->gqk"}> : () -> ()
    %cst_44 = arith.constant dense<0.000000e+00> : vector<4x8x8xf32>
    %104 = tpu.matmul %95, %99, %cst_44 {dimension_numbers = #tpu.dot_dimension_numbers<[2], [2], [1], [1], [0, 0, 0, 1, 1, 1], [0], [0]>} : vector<4x8x8xbf16>, vector<4x8x8xbf16>, vector<4x8x8xf32> -> vector<4x8x8xf32>
    "tpu.trace_stop"() : () -> ()
    %cst_45 = arith.constant 0.353553385 : f32
    %105 = vector.broadcast %cst_45 : f32 to vector<4x8x8xf32>
    %106 = arith.mulf %104, %105 : vector<4x8x8xf32>
    %107 = vector.shape_cast %106 : vector<4x8x8xf32> to vector<1x4x8x8xf32>
    %108 = vector.shape_cast %91 : vector<1x1x8xf32> to vector<1x1x1x8xf32>
    %109 = vector.broadcast %108 : vector<1x1x1x8xf32> to vector<1x4x8x8xf32>
    %110 = arith.addf %107, %109 : vector<1x4x8x8xf32>
    %111 = vector.shape_cast %110 : vector<1x4x8x8xf32> to vector<4x8x8xf32>
    %cst_46 = arith.constant dense<0xFF800000> : vector<4x8xf32>
    %112 = vector.multi_reduction <maximumf>, %111, %cst_46 [2] : vector<4x8x8xf32> to vector<4x8xf32>
    %113 = vector.shape_cast %112 : vector<4x8xf32> to vector<4x8x1xf32>
    %114 = vector.broadcast %113 : vector<4x8x1xf32> to vector<4x8x8xf32>
    %115 = arith.subf %111, %114 : vector<4x8x8xf32>
    %116 = math.exp %115 : vector<4x8x8xf32>
    %cst_47 = arith.constant dense<0.000000e+00> : vector<4x8xf32>
    %117 = vector.multi_reduction <add>, %116, %cst_47 [2] : vector<4x8x8xf32> to vector<4x8xf32>
    %118 = vector.shape_cast %117 : vector<4x8xf32> to vector<4x8x1xf32>
    %119 = vector.broadcast %118 : vector<4x8x1xf32> to vector<4x8x8xf32>
    %120 = arith.divf %116, %119 : vector<4x8x8xf32>
    %121 = arith.truncf %120 : vector<4x8x8xf32> to vector<4x8x8xbf16>
    "tpu.trace_start"() <{level = 10 : i32, message = "gqk,gkd->gqd"}> : () -> ()
    %cst_48 = arith.constant dense<0.000000e+00> : vector<4x8x8xf32>
    %122 = tpu.matmul %121, %103, %cst_48 {dimension_numbers = #tpu.dot_dimension_numbers<[2], [1], [1], [2], [0, 0, 0, 1, 1, 2], [0], [0]>} : vector<4x8x8xbf16>, vector<4x8x8xbf16>, vector<4x8x8xf32> -> vector<4x8x8xf32>
    "tpu.trace_stop"() : () -> ()
    %123 = vector.shape_cast %122 : vector<4x8x8xf32> to vector<1x4x8x8xf32>
    %124 = tpu.transpose %123, [0, 2, 1, 3] : vector<1x4x8x8xf32> -> vector<1x8x4x8xf32>
    %125 = vector.shape_cast %124 : vector<1x8x4x8xf32> to vector<8x32xf32>
    %126 = vector.shape_cast %120 : vector<4x8x8xf32> to vector<1x4x8x8xf32>
    %127 = tpu.transpose %126, [0, 2, 1, 3] : vector<1x4x8x8xf32> -> vector<1x8x4x8xf32>
    %128 = vector.shape_cast %127 : vector<1x8x4x8xf32> to vector<1x8x32xf32>
    %c0_49 = arith.constant 0 : index
    %c0_50 = arith.constant 0 : index
    %c0_51 = arith.constant 0 : index
    %129 = vector.load %arg26[%c0_49, %c0_50, %c0_51] : memref<1x8x32xf32, #tpu.memory_space<vmem>>, vector<1x8x32xf32>
    tpu.vector_store %arg26[%c0_49, %c0_50, %c0_51], %128 {strides = array<i32>} : memref<1x8x32xf32, #tpu.memory_space<vmem>>, vector<1x8x32xf32>,
    %130 = arith.truncf %125 : vector<8x32xf32> to vector<8x32xbf16>
    %c0_52 = arith.constant 0 : index
    %c0_53 = arith.constant 0 : index
    %131 = vector.load %arg15[%c0_52, %c0_53] : memref<32x32xbf16, #tpu.memory_space<vmem>>, vector<32x32xbf16>
    %cst_54 = arith.constant dense<0.000000e+00> : vector<8x32xf32>
    %132 = tpu.matmul %130, %131, %cst_54 {dimension_numbers = #tpu.dot_dimension_numbers<[1], [0], [0], [1], [0, 0, 1, 1], [], []>} : vector<8x32xbf16>, vector<32x32xbf16>, vector<8x32xf32> -> vector<8x32xf32>
    %c0_55 = arith.constant 0 : index
    %c0_56 = arith.constant 0 : index
    %133 = vector.load %arg16[%c0_55, %c0_56] : memref<1x32xf32, #tpu.memory_space<vmem>>, vector<1x32xf32>
    %134 = vector.broadcast %133 : vector<1x32xf32> to vector<8x32xf32>
    %135 = arith.addf %132, %134 : vector<8x32xf32>
    %136 = arith.addf %77, %135 : vector<8x32xf32>
    %cst_57 = arith.constant dense<0.000000e+00> : vector<8xf32>
    %137 = vector.multi_reduction <add>, %136, %cst_57 [1] : vector<8x32xf32> to vector<8xf32>
    %138 = vector.shape_cast %137 : vector<8xf32> to vector<8x1xf32>
    %cst_58 = arith.constant 3.200000e+01 : f32
    %139 = vector.broadcast %cst_58 : f32 to vector<8x1xf32>
    %140 = arith.divf %138, %139 : vector<8x1xf32>
    %141 = vector.broadcast %140 : vector<8x1xf32> to vector<8x32xf32>
    %142 = arith.subf %136, %141 : vector<8x32xf32>
    %143 = arith.mulf %142, %142 : vector<8x32xf32>
    %cst_59 = arith.constant dense<0.000000e+00> : vector<8xf32>
    %144 = vector.multi_reduction <add>, %143, %cst_59 [1] : vector<8x32xf32> to vector<8xf32>
    %145 = vector.shape_cast %144 : vector<8xf32> to vector<8x1xf32>
    %cst_60 = arith.constant 3.200000e+01 : f32
    %146 = vector.broadcast %cst_60 : f32 to vector<8x1xf32>
    %147 = arith.divf %145, %146 : vector<8x1xf32>
    %cst_61 = arith.constant 9.99999974E-6 : f32
    %148 = vector.broadcast %cst_61 : f32 to vector<8x1xf32>
    %149 = arith.addf %147, %148 : vector<8x1xf32>
    %150 = math.rsqrt %149 : vector<8x1xf32>
    %151 = vector.broadcast %150 : vector<8x1xf32> to vector<8x32xf32>
    %152 = arith.mulf %142, %151 : vector<8x32xf32>
    %c0_62 = arith.constant 0 : index
    %c0_63 = arith.constant 0 : index
    %153 = vector.load %arg17[%c0_62, %c0_63] : memref<1x32xf32, #tpu.memory_space<vmem>>, vector<1x32xf32>
    %154 = vector.broadcast %153 : vector<1x32xf32> to vector<8x32xf32>
    %155 = arith.mulf %152, %154 : vector<8x32xf32>
    %c0_64 = arith.constant 0 : index
    %c0_65 = arith.constant 0 : index
    %156 = vector.load %arg18[%c0_64, %c0_65] : memref<1x32xf32, #tpu.memory_space<vmem>>, vector<1x32xf32>
    %157 = vector.broadcast %156 : vector<1x32xf32> to vector<8x32xf32>
    %158 = arith.addf %155, %157 : vector<8x32xf32>
    %159 = arith.truncf %158 : vector<8x32xf32> to vector<8x32xbf16>
    %c0_66 = arith.constant 0 : index
    %c0_67 = arith.constant 0 : index
    %160 = vector.load %arg19[%c0_66, %c0_67] : memref<32x64xbf16, #tpu.memory_space<vmem>>, vector<32x64xbf16>
    %cst_68 = arith.constant dense<0.000000e+00> : vector<8x64xf32>
    %161 = tpu.matmul %159, %160, %cst_68 {dimension_numbers = #tpu.dot_dimension_numbers<[1], [0], [0], [1], [0, 0, 1, 1], [], []>} : vector<8x32xbf16>, vector<32x64xbf16>, vector<8x64xf32> -> vector<8x64xf32>
    %c0_69 = arith.constant 0 : index
    %c0_70 = arith.constant 0 : index
    %162 = vector.load %arg20[%c0_69, %c0_70] : memref<1x64xf32, #tpu.memory_space<vmem>>, vector<1x64xf32>
    %163 = vector.broadcast %162 : vector<1x64xf32> to vector<8x64xf32>
    %164 = arith.addf %161, %163 : vector<8x64xf32>
    %cst_71 = arith.constant 0.000000e+00 : f32
    %165 = vector.broadcast %cst_71 : f32 to vector<8x64xf32>
    %166 = arith.maximumf %164, %165 : vector<8x64xf32>
    %167 = arith.truncf %166 : vector<8x64xf32> to vector<8x64xbf16>
    %c0_72 = arith.constant 0 : index
    %c0_73 = arith.constant 0 : index
    %168 = vector.load %arg21[%c0_72, %c0_73] : memref<64x32xbf16, #tpu.memory_space<vmem>>, vector<64x32xbf16>
    %cst_74 = arith.constant dense<0.000000e+00> : vector<8x32xf32>
    %169 = tpu.matmul %167, %168, %cst_74 {dimension_numbers = #tpu.dot_dimension_numbers<[1], [0], [0], [1], [0, 0, 1, 1], [], []>} : vector<8x64xbf16>, vector<64x32xbf16>, vector<8x32xf32> -> vector<8x32xf32>
    %c0_75 = arith.constant 0 : index
    %c0_76 = arith.constant 0 : index
    %170 = vector.load %arg22[%c0_75, %c0_76] : memref<1x32xf32, #tpu.memory_space<vmem>>, vector<1x32xf32>
    %171 = vector.broadcast %170 : vector<1x32xf32> to vector<8x32xf32>
    %172 = arith.addf %169, %171 : vector<8x32xf32>
    %173 = arith.addf %158, %172 : vector<8x32xf32>
    %cst_77 = arith.constant dense<0.000000e+00> : vector<8xf32>
    %174 = vector.multi_reduction <add>, %173, %cst_77 [1] : vector<8x32xf32> to vector<8xf32>
    %175 = vector.shape_cast %174 : vector<8xf32> to vector<8x1xf32>
    %cst_78 = arith.constant 3.200000e+01 : f32
    %176 = vector.broadcast %cst_78 : f32 to vector<8x1xf32>
    %177 = arith.divf %175, %176 : vector<8x1xf32>
    %178 = vector.broadcast %177 : vector<8x1xf32> to vector<8x32xf32>
    %179 = arith.subf %173, %178 : vector<8x32xf32>
    %180 = arith.mulf %179, %179 : vector<8x32xf32>
    %cst_79 = arith.constant dense<0.000000e+00> : vector<8xf32>
    %181 = vector.multi_reduction <add>, %180, %cst_79 [1] : vector<8x32xf32> to vector<8xf32>
    %182 = vector.shape_cast %181 : vector<8xf32> to vector<8x1xf32>
    %cst_80 = arith.constant 3.200000e+01 : f32
    %183 = vector.broadcast %cst_80 : f32 to vector<8x1xf32>
    %184 = arith.divf %182, %183 : vector<8x1xf32>
    %cst_81 = arith.constant 9.99999974E-6 : f32
    %185 = vector.broadcast %cst_81 : f32 to vector<8x1xf32>
    %186 = arith.addf %184, %185 : vector<8x1xf32>
    %187 = math.rsqrt %186 : vector<8x1xf32>
    %188 = vector.broadcast %187 : vector<8x1xf32> to vector<8x32xf32>
    %189 = arith.mulf %179, %188 : vector<8x32xf32>
    %c0_82 = arith.constant 0 : index
    %c0_83 = arith.constant 0 : index
    %190 = vector.load %arg23[%c0_82, %c0_83] : memref<1x32xf32, #tpu.memory_space<vmem>>, vector<1x32xf32>
    %191 = vector.broadcast %190 : vector<1x32xf32> to vector<8x32xf32>
    %192 = arith.mulf %189, %191 : vector<8x32xf32>
    %c0_84 = arith.constant 0 : index
    %c0_85 = arith.constant 0 : index
    %193 = vector.load %arg24[%c0_84, %c0_85] : memref<1x32xf32, #tpu.memory_space<vmem>>, vector<1x32xf32>
    %194 = vector.broadcast %193 : vector<1x32xf32> to vector<8x32xf32>
    %195 = arith.addf %192, %194 : vector<8x32xf32>
    %196 = vector.shape_cast %195 : vector<8x32xf32> to vector<1x8x32xf32>
    %c0_86 = arith.constant 0 : index
    %c0_87 = arith.constant 0 : index
    %c0_88 = arith.constant 0 : index
    %197 = vector.load %arg25[%c0_86, %c0_87, %c0_88] : memref<1x8x32xf32, #tpu.memory_space<vmem>>, vector<1x8x32xf32>
    tpu.vector_store %arg25[%c0_86, %c0_87, %c0_88], %196 {strides = array<i32>} : memref<1x8x32xf32, #tpu.memory_space<vmem>>, vector<1x8x32xf32>,
    return
  }
  func.func @transform_0(%arg0: i32) -> (i32, i32, i32) {
    %c0_i32 = arith.constant 0 : i32
    %c0_i32_0 = arith.constant 0 : i32
    %c0_i32_1 = arith.constant 0 : i32
    return %arg0, %c0_i32, %c0_i32_0 : i32, i32, i32
  }
  func.func @transform_1(%arg0: i32) -> (i32, i32, i32) {
    %c0_i32 = arith.constant 0 : i32
    %c0_i32_0 = arith.constant 0 : i32
    %c0_i32_1 = arith.constant 0 : i32
    return %arg0, %c0_i32, %c0_i32_0 : i32, i32, i32
  }
  func.func @transform_2(%arg0: i32) -> (i32, i32, i32) {
    %c0_i32 = arith.constant 0 : i32
    %c0_i32_0 = arith.constant 0 : i32
    %c0_i32_1 = arith.constant 0 : i32
    return %arg0, %c0_i32, %c0_i32_0 : i32, i32, i32
  }
  func.func @transform_3(%arg0: i32) -> (i32, i32, i32) {
    %c0_i32 = arith.constant 0 : i32
    %c0_i32_0 = arith.constant 0 : i32
    %c0_i32_1 = arith.constant 0 : i32
    return %arg0, %c0_i32, %c0_i32_0 : i32, i32, i32
  }
  func.func @transform_4(%arg0: i32) -> (i32, i32) {
    %c0_i32 = arith.constant 0 : i32
    %c0_i32_0 = arith.constant 0 : i32
    %c0_i32_1 = arith.constant 0 : i32
    return %c0_i32, %c0_i32_0 : i32, i32
  }
  func.func @transform_5(%arg0: i32) -> (i32, i32) {
    %c0_i32 = arith.constant 0 : i32
    %c0_i32_0 = arith.constant 0 : i32
    %c0_i32_1 = arith.constant 0 : i32
    return %c0_i32, %c0_i32_0 : i32, i32
  }
  func.func @transform_6(%arg0: i32) -> (i32, i32) {
    %c0_i32 = arith.constant 0 : i32
    %c0_i32_0 = arith.constant 0 : i32
    %c0_i32_1 = arith.constant 0 : i32
    return %c0_i32, %c0_i32_0 : i32, i32
  }
  func.func @transform_7(%arg0: i32) -> (i32, i32) {
    %c0_i32 = arith.constant 0 : i32
    %c0_i32_0 = arith.constant 0 : i32
    %c0_i32_1 = arith.constant 0 : i32
    return %c0_i32, %c0_i32_0 : i32, i32
  }
  func.func @transform_8(%arg0: i32) -> (i32, i32) {
    %c0_i32 = arith.constant 0 : i32
    %c0_i32_0 = arith.constant 0 : i32
    %c0_i32_1 = arith.constant 0 : i32
    return %c0_i32, %c0_i32_0 : i32, i32
  }
  func.func @transform_9(%arg0: i32) -> (i32, i32) {
    %c0_i32 = arith.constant 0 : i32
    %c0_i32_0 = arith.constant 0 : i32
    %c0_i32_1 = arith.constant 0 : i32
    return %c0_i32, %c0_i32_0 : i32, i32
  }
  func.func @transform_10(%arg0: i32) -> (i32, i32) {
    %c0_i32 = arith.constant 0 : i32
    %c0_i32_0 = arith.constant 0 : i32
    %c0_i32_1 = arith.constant 0 : i32
    return %c0_i32, %c0_i32_0 : i32, i32
  }
  func.func @transform_11(%arg0: i32) -> (i32, i32) {
    %c0_i32 = arith.constant 0 : i32
    %c0_i32_0 = arith.constant 0 : i32
    %c0_i32_1 = arith.constant 0 : i32
    return %c0_i32, %c0_i32_0 : i32, i32
  }
  func.func @transform_12(%arg0: i32) -> (i32, i32) {
    %c0_i32 = arith.constant 0 : i32
    %c0_i32_0 = arith.constant 0 : i32
    %c0_i32_1 = arith.constant 0 : i32
    return %c0_i32, %c0_i32_0 : i32, i32
  }
  func.func @transform_13(%arg0: i32) -> (i32, i32) {
    %c0_i32 = arith.constant 0 : i32
    %c0_i32_0 = arith.constant 0 : i32
    %c0_i32_1 = arith.constant 0 : i32
    return %c0_i32, %c0_i32_0 : i32, i32
  }
  func.func @transform_14(%arg0: i32) -> (i32, i32) {
    %c0_i32 = arith.constant 0 : i32
    %c0_i32_0 = arith.constant 0 : i32
    %c0_i32_1 = arith.constant 0 : i32
    return %c0_i32, %c0_i32_0 : i32, i32
  }
  func.func @transform_15(%arg0: i32) -> (i32, i32) {
    %c0_i32 = arith.constant 0 : i32
    %c0_i32_0 = arith.constant 0 : i32
    %c0_i32_1 = arith.constant 0 : i32
    return %c0_i32, %c0_i32_0 : i32, i32
  }
  func.func @transform_16(%arg0: i32) -> (i32, i32) {
    %c0_i32 = arith.constant 0 : i32
    %c0_i32_0 = arith.constant 0 : i32
    %c0_i32_1 = arith.constant 0 : i32
    return %c0_i32, %c0_i32_0 : i32, i32
  }
  func.func @transform_17(%arg0: i32) -> (i32, i32) {
    %c0_i32 = arith.constant 0 : i32
    %c0_i32_0 = arith.constant 0 : i32
    %c0_i32_1 = arith.constant 0 : i32
    return %c0_i32, %c0_i32_0 : i32, i32
  }
  func.func @transform_18(%arg0: i32) -> (i32, i32) {
    %c0_i32 = arith.constant 0 : i32
    %c0_i32_0 = arith.constant 0 : i32
    %c0_i32_1 = arith.constant 0 : i32
    return %c0_i32, %c0_i32_0 : i32, i32
  }
  func.func @transform_19(%arg0: i32) -> (i32, i32) {
    %c0_i32 = arith.constant 0 : i32
    %c0_i32_0 = arith.constant 0 : i32
    %c0_i32_1 = arith.constant 0 : i32
    return %c0_i32, %c0_i32_0 : i32, i32
  }
  func.func @transform_20(%arg0: i32) -> (i32, i32) {
    %c0_i32 = arith.constant 0 : i32
    %c0_i32_0 = arith.constant 0 : i32
    %c0_i32_1 = arith.constant 0 : i32
    return %c0_i32, %c0_i32_0 : i32, i32
  }
  func.func @transform_21(%arg0: i32) -> (i32, i32) {
    %c0_i32 = arith.constant 0 : i32
    %c0_i32_0 = arith.constant 0 : i32
    %c0_i32_1 = arith.constant 0 : i32
    return %c0_i32, %c0_i32_0 : i32, i32
  }
  func.func @transform_22(%arg0: i32) -> (i32, i32) {
    %c0_i32 = arith.constant 0 : i32
    %c0_i32_0 = arith.constant 0 : i32
    %c0_i32_1 = arith.constant 0 : i32
    return %c0_i32, %c0_i32_0 : i32, i32
  }
  func.func @transform_23(%arg0: i32) -> (i32, i32) {
    %c0_i32 = arith.constant 0 : i32
    %c0_i32_0 = arith.constant 0 : i32
    %c0_i32_1 = arith.constant 0 : i32
    return %c0_i32, %c0_i32_0 : i32, i32
  }
  func.func @transform_24(%arg0: i32) -> (i32, i32, i32) {
    %c0_i32 = arith.constant 0 : i32
    %c0_i32_0 = arith.constant 0 : i32
    %c0_i32_1 = arith.constant 0 : i32
    return %arg0, %c0_i32, %c0_i32_0 : i32, i32, i32
  }
  func.func @transform_25(%arg0: i32) -> (i32, i32, i32) {
    %c0_i32 = arith.constant 0 : i32
    %c0_i32_0 = arith.constant 0 : i32
    %c0_i32_1 = arith.constant 0 : i32
    return %arg0, %c0_i32, %c0_i32_0 : i32, i32, i32
  }
}

</mosaic_0001>

<bundles_post_ra>
// kernel: decoder_layer.1
= control target key start
LH: loop header
LB: loop body
LE: loop exit
PB: predicated region body
PF: predicated region fallthrough
CT: control target
= control target key end

     0   :  { %s4201_s0 = inlined_call_operand.vmem [shape: f32[2,8,32], index: 0, kind: input, shape index: {}]   ;;  %s4202_s1 = inlined_call_operand.vmem [shape: f32[2,8,32], index: 1, kind: input, shape index: {}]   ;;  %s4203_s2 = inlined_call_operand.vmem [shape: f32[2,8,8], index: 2, kind: input, shape index: {}]   ;;  %s4204_s3 = inlined_call_operand.vmem [shape: f32[2,1,8], index: 3, kind: input, shape index: {}]   ;;  %s4205_s4 = inlined_call_operand.vmem [shape: bf16[32,96], index: 4, kind: input, shape index: {}]   ;;  %s4206_s5 = inlined_call_operand.vmem [shape: f32[1,96], index: 5, kind: input, shape index: {}]   ;;  %s4207_s6 = inlined_call_operand.vmem [shape: bf16[32,32], index: 6, kind: input, shape index: {}]   ;;  %s4208_s7 = inlined_call_operand.vmem [shape: f32[1,32], index: 7, kind: input, shape index: {}]   ;;  %s4209_s8 = inlined_call_operand.vmem [shape: f32[1,32], index: 8, kind: input, shape index: {}]   ;;  %s4210_s9 = inlined_call_operand.vmem [shape: f32[1,32], index: 9, kind: input, shape index: {}]   ;;  %s4211_s10 = inlined_call_operand.vmem [shape: bf16[32,32], index: 10, kind: input, shape index: {}]   ;;  %s4212_s11 = inlined_call_operand.vmem [shape: f32[1,32], index: 11, kind: input, shape index: {}]   ;;  %s4213_s12 = inlined_call_operand.vmem [shape: bf16[32,64], index: 12, kind: input, shape index: {}]   ;;  %s4214_s13 = inlined_call_operand.vmem [shape: f32[1,64], index: 13, kind: input, shape index: {}]   ;;  %s4215_s14 = inlined_call_operand.vmem [shape: bf16[32,32], index: 14, kind: input, shape index: {}]   ;;  %s4216_s15 = inlined_call_operand.vmem [shape: f32[1,32], index: 15, kind: input, shape index: {}]   ;;  %s4217_s16 = inlined_call_operand.vmem [shape: f32[1,32], index: 16, kind: input, shape index: {}]   ;;  %s4218_s17 = inlined_call_operand.vmem [shape: f32[1,32], index: 17, kind: input, shape index: {}]   ;;  %s4219_s18 = inlined_call_operand.vmem [shape: bf16[32,64], index: 18, kind: input, shape index: {}]   ;;  %s4220_s19 = inlined_call_operand.vmem [shape: f32[1,64], index: 19, kind: input, shape index: {}]   ;;  %s4221_s20 = inlined_call_operand.vmem [shape: bf16[64,32], index: 20, kind: input, shape index: {}]   ;;  %s4222_s21 = inlined_call_operand.vmem [shape: f32[1,32], index: 21, kind: input, shape index: {}]   ;;  %s4223_s22 = inlined_call_operand.vmem [shape: f32[1,32], index: 22, kind: input, shape index: {}]   ;;  %s4224_s23 = inlined_call_operand.vmem [shape: f32[1,32], index: 23, kind: input, shape index: {}]   ;;  %s4225_s24 = inlined_call_operand.hbm [shape: f32[2,8,32], index: 24, kind: output, shape index: {0}]   ;;  %s4226_s25 = inlined_call_operand.vmem [shape: f32[2,8,32], index: 25, kind: output, shape index: {1}]  }
   0x1   :  { %4251 = sst [smem:[#allocation11_spill]] %s4201_s0 }
   0x2   :  { %4252 = sst [smem:[#allocation12_spill]] %s4202_s1 }
   0x3   :  { %4253 = sst [smem:[#allocation13_spill]] %s4203_s2 }
   0x4   :  { %4254 = sst [smem:[#allocation14_spill]] %s4204_s3 }
   0x5   :  { %4255 = sst [smem:[#allocation15_spill]] %s4205_s4 }
   0x6   :  { %4256 = sst [smem:[#allocation16_spill]] %s4206_s5 }
   0x7   :  { %4257 = sst [smem:[#allocation17_spill]] %s4207_s6 }
   0x8   :  { %4258 = sst [smem:[#allocation18_spill]] %s4208_s7 }
   0x9   :  { %4259 = sst [smem:[#allocation19_spill]] %s4209_s8 }
   0xa   :  { %4260 = sst [smem:[#allocation20_spill]] %s4210_s9 }
   0xb   :  { %4261 = sst [smem:[#allocation21_spill]] %s4211_s10 }
   0xc   :  { %31 = vsyncpa [#allocation3], 0 }
   0xd   :  { %33 = vsyncpa [#allocation3 + $0x1], 0  ;;  %s3457_s29 = smov 0   ;;  %s3459_s2 = smov 0  }
   0xe   :  { %s3461_s6 = smov 0   ;;  %s3463_s30 = smov 0  }
   0xf LB: > { %4262 = sst [smem:[#allocation5_spill]] %s3302_s29  ;;  %s3478_s7 = sadd.s32 4294967295, %s3314_s30   ;;  %s3314_s30 = sphi %s3463_s30, %s4291_s30   ;;  %s3310_s6 = sphi %s3461_s6, %s4293_s6   ;;  %s3306_s2 = sphi %s3459_s2, %s4295_s2   ;;  %s3302_s29 = sphi %s3457_s29, %s4294_s29  }
  0x10   : > { %4263 = sst [smem:[#allocation6_spill]] %s3310_s6  ;;  %s3002_s3 = sadd.s32 4294967294, %s3314_s30  }
  0x11   : > { %4264 = sst [smem:[#allocation7_spill]] %s3314_s30  ;;  %s3482_s26 = sadd.s32 1, %s3314_s30  }
  0x12   : > { %4265 = sst [smem:[#allocation8_spill]] %s3482_s26  ;;  %s570_s1 = sadd.s32 1, %s3310_s6 }
  0x13   : > { %s567_s8 = ssub.s32 %s3314_s30, %s3482_s26  ;;  %p580_p0 = scmp.ne.s32.totalorder %s3310_s6, %s3306_s2 }
  0x14   : > { %p568_p1 = scmp.eq.s32.totalorder %s567_s8, 0  ;;  %p581_p2 = scmp.eq.s32.totalorder %s3478_s7, 1 }
  0x15   : > { %p586_p3 = scmp.ne.s32.totalorder %s3306_s2, %s3302_s29  ;;  %p587_p4 = scmp.eq.s32.totalorder %s3002_s3, 1 }
  0x16   : > { %s3493_s27 = scalar_select %p568_p1, %s3310_s6, %s570_s1  }
  0x17   : > { %p3495_p5 = por %p581_p2, %p580_p0  ;;  %p3499_p6 = por %p587_p4, %p586_p3 }
  0x18   : > { %4266 = sst [smem:[#allocation9_spill]] %s3493_s27  ;;  %p3005_p7 = scmp.ge.s32.totalorder %s3314_s30, 1 }
  0x19   : > { %s4268_s28 = scalar_select %p3499_p6, 1, 0 }
  0x1a   : > { %p718_p8 = scmp.lt.s32.totalorder %s3314_s30, 3 }
  0x1b   : > { %4269 = sst [smem:[#allocation10_spill]] %s4268_s28 }
  0x1c   : > { %p719_p9 = pnand %p3005_p7, %p718_p8 }
  0x1d   : > { %s4270_s0 = sld [smem:[#allocation15_spill]] (!%p719_p9)  ;;  %p800_p10 = scmp.lt.s32.totalorder (!%p719_p9), %s3478_s7, 1 }
  0x1e   : > { %722 = sbr.rel (%p719_p9) target bundleno = 3430 (0xd66), region = 116  ;;  %s4271_s28 = sld [smem:[#allocation11_spill]] (!%p719_p9) }
  0x1f   : > { %s4272_s3 = sld [smem:[#allocation16_spill]] (!%p719_p9)  ;;  %s4236_s1 = smov (!%p719_p9), 104  }
  0x20   : > { %s4240_s6 = smov (!%p719_p9), 120   ;;  %s4234_s26 = smov (!%p719_p9), 96  }
  0x21   : > { %s4273_s5 = sld [smem:[#allocation13_spill]] (!%p719_p9)  ;;  %s4246_s9 = smov (!%p719_p9), 16  }
  0x22   : > { %s4279_s10 = sld [smem:[#allocation21_spill]] (!%p719_p9) }
  0x23   : > { %v3103_v0 = vld [vmem:[%s4270_s0 + $0x8] sm:$0xff]  ;;  %v3102_v1 = vld [vmem:[%s4270_s0] sm:$0xff]  ;;  %s3513_s8 = scalar_select %p800_p10, %s3478_s7, 1  ;;  %vm844_vm0 = vcmask 261120   ;;  %v3320_v14 = vmov 1983009808  }
  0x24   : > { %854 = vmatpush.bf16.msra.mxu0 %v3103_v0  ;;  %v878_v15 = vunpack.c.l.s4 %v3320_v14  ;;  %vm873_vm1 = vcmask 1047556   ;;  %v3321_v28 = vmov 1934713408   ;;  %vm1239_vm2 = vcmask 64512   ;;  %s4276_s0 = sld [smem:[#allocation12_spill]] }
  0x25   : > { %s3516_s27 = sshll.u32 %s3513_s8, 3  ;;  %v3198_v4 = vld [vmem:[%s4272_s3] ss:$0 sm:$0xff]  ;;  %v902_v29 = vunpack.c.l.s4 %v3321_v28  ;;  %vm1427_vm3 = vcmask 1043456  }
  0x26   : > { %s803_s29 = scalar_lea.vmem %s4271_s28, %s3516_s27  ;;  %v3543_v19 = vunpack.c.0.s8 %v878_v15  ;;  %s3322_s28 = smov 64  }
  0x27   : > { %v3522_v2 = vld [vmem:[%s803_s29] sm:$0xff]  ;;  %s4238_s29 = smov 112   ;;  %v3553_v34 = vunpack.c.0.s8 %v902_v29  ;;  %s811_s3 = scalar_lea.vmem %s4273_s5, %s3516_s27 }
  0x28   : > { %855 = vmatpush.bf16.msra.mxu0 %v3102_v1  ;;  %v823_v3 = vpack.c.bf16 %v3522_v2, %v3522_v2  ;;  %s4244_s5 = smov 8  }
  0x2b   : > { %3019 = vmatmul.msk.bf16.vlgmr.msra.gmra.mxu0 %vm844_vm0, %v823_v3 }
  0xa8   : > { %v857_v5 = vpop.f32.mrf.mxu0 }
  0xa9   : > { %v858_v6 = vadd.f32 %v3198_v4, %v857_v5 }
  0xab   : > { %869 = vrot.lane.b32.xlu1 %v858_v6, %s4236_s1  ;;  %863 = vrot.lane.b32.xlu0 %v858_v6, %s4240_s6  ;;  %v875_v16 = vrot.slane %v858_v6, 4  ;;  %s4274_s1 = sld [smem:[#allocation17_spill]] }
  0xb0   : > { %v859_v7 = vpop.f32.mrf.mxu0 }
  0xb3   : > { %866 = vrot.lane.b32.xlu0 %v858_v6, %s4238_s29  ;;  %s4280_s29 = smov 104  }
 0x11d   : > { %v864_v8 = vpop.permute.xlu0 %863  ;;  %v870_v10 = vpop.permute.xlu1 %869 }
 0x11e   : > { %v3533_v9 = vpack.i.bf16 %v864_v8, %v858_v6  ;;  %v885_v20 = vrot.slane %v870_v10, 4  ;;  %v887_v21 = vrot.slane %v864_v8, 4 }
 0x120   : > { %3169 = vrot.lane.b32.xlu1 %v3533_v9, %s4234_s26  ;;  %v886_v24 = vsel %vm873_vm1, %v885_v20, %v864_v8  ;;  %v888_v25 = vsel %vm873_vm1, %v870_v10, %v887_v21 }
 0x121   : > { %v892_v30 = vperm.slane %v886_v24, %v3543_v19  ;;  %v896_v31 = vperm.slane %v888_v25, %v3543_v19 }
 0x123   : > { %v897_v35 = vrot.slane %v892_v30, 4  ;;  %v909_v36 = vrot.slane %v896_v31, 4 }
 0x125   : > { %v867_v11 = vpop.permute.xlu0 %866 }
 0x126   : > { %v3537_v12 = vpack.i.bf16 %v870_v10, %v867_v11  ;;  %v872_v13 = vrot.slane %v867_v11, 4  ;;  %v876_v18 = vsel %vm873_vm1, %v867_v11, %v875_v16 }
 0x127   : > { %v884_v23 = vperm.slane %v876_v18, %v3543_v19 }
 0x128   : > { %3174 = vrot.lane.b32.xlu2 %v3537_v12, %s4234_s26  ;;  %v874_v17 = vsel %vm873_vm1, %v872_v13, %v858_v6  ;;  %s818_s26 = scalar_lea.vmem %s4226_s25, %s3516_s27 }
 0x129   : > { %v880_v22 = vperm.slane %v874_v17, %v3543_v19  ;;  %v911_v27 = vrot.slane %v884_v23, 4  ;;  %v910_v41 = vsel %vm873_vm1, %v909_v36, %v884_v23 }
 0x12a   : > { %v916_v45 = vperm.slane %v910_v41, %v3553_v34 }
 0x12b   : > { %v899_v26 = vrot.slane %v880_v22, 4  ;;  %v912_v33 = vsel %vm873_vm1, %v896_v31, %v911_v27  ;;  %v898_v40 = vsel %vm873_vm1, %v897_v35, %v880_v22 }
 0x12c   : > { %v920_v38 = vperm.slane %v912_v33, %v3553_v34  ;;  %v904_v44 = vperm.slane %v898_v40, %v3553_v34  ;;  %v925_v55 = vrot.slane %v916_v45, 4 }
 0x12d   : > { %v900_v32 = vsel %vm873_vm1, %v892_v30, %v899_v26 }
 0x12e   : > { %v908_v37 = vperm.slane %v900_v32, %v3553_v34  ;;  %v927_v47 = vrot.slane %v920_v38, 4  ;;  %v921_v53 = vrot.slane %v904_v44, 4  ;;  %v926_v11 = vsel %vm873_vm1, 0.0, %v925_v55 }
 0x130   : > { %v923_v46 = vrot.slane %v908_v37, 4  ;;  %v928_v56 = vsel %vm873_vm1, 0.0, %v927_v47  ;;  %v940_v61 = vsel %vm873_vm1, %v927_v47, %v916_v45  ;;  %v922_v10 = vsel %vm873_vm1, 0.0, %v921_v53 }
 0x131   : > { %v945_v1 = vrot.slane %v928_v56, 4  ;;  %v944_v18 = vperm.slane %v940_v61, %v3543_v19 }
 0x132   : > { %v924_v54 = vsel %vm873_vm1, 0.0, %v923_v46  ;;  %v929_v13 = vsel %vm873_vm1, %v923_v46, %v904_v44 }
 0x133   : > { %v934_v0 = vrot.slane %v924_v54, 4  ;;  %v946_v23 = vsel %vm873_vm1, %v945_v1, %v926_v11  ;;  %v933_v26 = vperm.slane %v929_v13, %v3543_v19  ;;  %v965_v40 = vrot.slane %v944_v18, 4 }
 0x134   : > { %v950_v36 = vperm.slane %v946_v23, %v3543_v19 }
 0x135   : > { %v935_v22 = vsel %vm873_vm1, %v934_v0, %v922_v10 }
 0x136   : > { %v939_v31 = vperm.slane %v935_v22, %v3543_v19 }
 0x182   : > { %v3175_v39 = vpop.permute.xlu2 %3174 }
 0x183   : > { %v3177_v42 = vunpack.i.h.bf16 %v3175_v39  ;;  %v3176_v43 = vunpack.i.l.bf16 %v3175_v39  ;;  %v953_v39 = vrot.slane %v933_v26, 4 }
 0x185   : > { %v1011_v49 = vrot.slane %v3177_v42, 4  ;;  %v999_v50 = vrot.slane %v3176_v43, 4 }
 0x192   : > { %v3170_v48 = vpop.permute.xlu1 %3169 }
 0x193   : > { %v3172_v51 = vunpack.i.h.bf16 %v3170_v48  ;;  %v3171_v52 = vunpack.i.l.bf16 %v3170_v48  ;;  %v951_v48 = vrot.slane %v939_v31, 4 }
 0x195   : > { %v1013_v57 = vrot.slane %v3172_v51, 4  ;;  %v1000_v58 = vsel %vm873_vm1, %v999_v50, %v3171_v52  ;;  %v1001_v59 = vrot.slane %v3171_v52, 4  ;;  %v1012_v60 = vsel %vm873_vm1, %v1011_v49, %v3172_v51 }
 0x196   : > { %v1006_v62 = vperm.slane %v1000_v58, %v3543_v19  ;;  %v1018_v63 = vperm.slane %v1012_v60, %v3543_v19  ;;  %v963_v52 = vrot.slane %v950_v36, 4  ;;  %v954_v58 = vsel %vm873_vm1, %v939_v31, %v953_v39 }
 0x197   : > { %v1002_v3 = vsel %vm873_vm1, %v3176_v43, %v1001_v59  ;;  %v1014_v4 = vsel %vm873_vm1, %v3177_v42, %v1013_v57  ;;  %v966_v60 = vsel %vm873_vm1, %v950_v36, %v965_v40  ;;  %v952_v61 = vsel %vm873_vm1, %v951_v48, %v933_v26 }
 0x198   : > { %v1010_v5 = vperm.slane %v1002_v3, %v3543_v19  ;;  %v1022_v6 = vperm.slane %v1014_v4, %v3543_v19  ;;  %v1023_v7 = vrot.slane %v1018_v63, 4  ;;  %v1025_v8 = vrot.slane %v1006_v62, 4 }
 0x199   : > { %v964_v1 = vsel %vm873_vm1, %v963_v52, %v944_v18  ;;  %v958_v10 = vperm.slane %v952_v61, %v3553_v34 }
 0x19a   : > { %v1024_v14 = vsel %vm873_vm1, %v1023_v7, %v1006_v62  ;;  %v1026_v15 = vsel %vm873_vm1, %v1018_v63, %v1025_v8  ;;  %v1035_v16 = vrot.slane %v1022_v6, 4  ;;  %v1037_v17 = vrot.slane %v1010_v5, 4 }
 0x19b   : > { %v1030_v20 = vperm.slane %v1024_v14, %v3553_v34  ;;  %v1034_v21 = vperm.slane %v1026_v15, %v3553_v34  ;;  %v974_v8 = vperm.slane %v966_v60, %v3553_v34 }
 0x19c   : > { %v1036_v24 = vsel %vm873_vm1, %v1035_v16, %v1010_v5  ;;  %v1038_v25 = vsel %vm873_vm1, %v1022_v6, %v1037_v17  ;;  %v962_v6 = vperm.slane %v954_v58, %v3553_v34  ;;  %v970_v17 = vperm.slane %v964_v1, %v3553_v34 }
 0x19d   : > { %v1042_v27 = vperm.slane %v1036_v24, %v3553_v34  ;;  %v1046_v28 = vperm.slane %v1038_v25, %v3553_v34  ;;  %v1047_v29 = vrot.slane %v1030_v20, 4  ;;  %v1049_v30 = vrot.slane %v1034_v21, 4 }
 0x19e   : > { %v981_v22 = vrot.slane %v962_v6, 4 }
 0x19f   : > { %v1050_v32 = vsel %vm873_vm1, 0.0, %v1049_v30  ;;  %v1051_v33 = vrot.slane %v1042_v27, 4  ;;  %v1053_v35 = vrot.slane %v1046_v28, 4  ;;  %v1055_v37 = vsel %vm873_vm1, %v1049_v30, %v1030_v20 }
 0x1a0   : > { %v1060_v38 = vrot.slane %v1050_v32, 4  ;;  %v1048_v41 = vsel %vm873_vm1, 0.0, %v1047_v29  ;;  %v1059_v43 = vperm.slane %v1055_v37, %v3543_v19  ;;  %v979_v28 = vrot.slane %v974_v8, 4 }
 0x1a1   : > { %v1054_v42 = vsel %vm873_vm1, 0.0, %v1053_v35  ;;  %v1066_v44 = vsel %vm873_vm1, %v1053_v35, %v1042_v27  ;;  %v1052_v49 = vsel %vm873_vm1, 0.0, %v1051_v33  ;;  %v977_v27 = vrot.slane %v958_v10, 4 }
 0x1a2   : > { %v1071_v45 = vrot.slane %v1054_v42, 4  ;;  %v1061_v46 = vsel %vm873_vm1, %v1060_v38, %v1048_v41  ;;  %v1070_v47 = vperm.slane %v1066_v44, %v3543_v19  ;;  %v1079_v51 = vrot.slane %v1059_v43, 4 }
 0x1a3   : > { %v1065_v50 = vperm.slane %v1061_v46, %v3543_v19  ;;  %v982_v32 = vsel %vm873_vm1, %v974_v8, %v981_v22  ;;  %v975_v33 = vrot.slane %v970_v17, 4  ;;  %v978_v36 = vsel %vm873_vm1, %v970_v17, %v977_v27  ;;  %v861_v46 = vld [vmem:[%s811_s3] sm:$0xff]  ;;  %s4242_s3 = smov 24  }
 0x1a4   : > { %v1072_v53 = vsel %vm873_vm1, %v1071_v45, %v1052_v49  ;;  %v1091_v54 = vrot.slane %v1070_v47, 4  ;;  %v980_v37 = vsel %vm873_vm1, %v979_v28, %v962_v6  ;;  %v986_v38 = vpack.c.bf16 %v982_v32, %v982_v32 }
 0x1a5   : > { %v1076_v55 = vperm.slane %v1072_v53, %v3543_v19  ;;  %v1080_v56 = vsel %vm873_vm1, %v1065_v50, %v1079_v51  ;;  %v1077_v57 = vrot.slane %v1065_v50, 4  ;;  %v976_v39 = vsel %vm873_vm1, %v975_v33, %v958_v10 }
 0x1a6   : > { %v1088_v59 = vperm.slane %v1080_v56, %v3553_v34  ;;  %v984_v40 = vpack.c.bf16 %v978_v36, %v978_v36  ;;  %v985_v41 = vpack.c.bf16 %v980_v37, %v980_v37  ;;  %v983_v42 = vpack.c.bf16 %v976_v39, %v976_v39 }
 0x1a7   : > { %v1092_v62 = vsel %vm873_vm1, %v1076_v55, %v1091_v54  ;;  %v1078_v63 = vsel %vm873_vm1, %v1077_v57, %v1059_v43  ;;  %v1089_v0 = vrot.slane %v1076_v55, 4 }
 0x1a8   : > { %v1100_v3 = vperm.slane %v1092_v62, %v3553_v34  ;;  %v1107_v4 = vrot.slane %v1088_v59, 4  ;;  %v1084_v5 = vperm.slane %v1078_v63, %v3553_v34 }
 0x1a9   : > { %v1090_v7 = vsel %vm873_vm1, %v1089_v0, %v1070_v47 }
 0x1aa   : > { %v1108_v11 = vsel %vm873_vm1, %v1100_v3, %v1107_v4  ;;  %v1096_v13 = vperm.slane %v1090_v7, %v3553_v34  ;;  %v1103_v14 = vrot.slane %v1084_v5, 4  ;;  %v1105_v15 = vrot.slane %v1100_v3, 4 }
 0x1ab   : > { %v1112_v16 = vpack.c.bf16 %v1108_v11, %v1108_v11 }
 0x1ac   : > { %v1104_v18 = vsel %vm873_vm1, %v1096_v13, %v1103_v14  ;;  %v1106_v20 = vsel %vm873_vm1, %v1105_v15, %v1088_v59  ;;  %v1101_v21 = vrot.slane %v1096_v13, 4 }
 0x1ad   : > { %v1301_v23 = vsel %vm1239_vm2, %v1112_v16, 0  ;;  %v1110_v24 = vpack.c.bf16 %v1104_v18, %v1104_v18  ;;  %v1111_v25 = vpack.c.bf16 %v1106_v20, %v1106_v20 }
 0x1ae   : > { %1310 = vmatpush.bf16.xpose.msrb.mxu0 %v1301_v23  ;;  %v1102_v26 = vsel %vm873_vm1, %v1101_v21, %v1084_v5 }
 0x1af   : > { %v1263_v29 = vsel %vm1239_vm2, %v1110_v24, 0  ;;  %v1282_v30 = vsel %vm1239_vm2, %v1111_v25, 0  ;;  %v1109_v31 = vpack.c.bf16 %v1102_v26, %v1102_v26 }
 0x1b0   : > { %1272 = vmatpush.bf16.xpose.msra.mxu2 %v1263_v29  ;;  %1291 = vmatpush.bf16.xpose.msra.mxu3 %v1282_v30 }
 0x1b1   : > { %v1244_v35 = vsel %vm1239_vm2, %v1109_v31, 0 }
 0x1b2   : > { %1253 = vmatpush.bf16.xpose.msra.mxu1 %v1244_v35 }
 0x1b5   : > { %3023 = vmatmul.msk.bf16.vlgmr.msrb.gmra.mxu0 %vm1239_vm2, %v986_v38 }
 0x1b7   : > { %3021 = vmatmul.msk.bf16.vlgmr.msra.gmra.mxu2 %vm1239_vm2, %v984_v40  ;;  %3022 = vmatmul.msk.bf16.vlgmr.msra.gmra.mxu3 %vm1239_vm2, %v985_v41 }
 0x1b9   : > { %3020 = vmatmul.msk.bf16.vlgmr.msra.gmra.mxu1 %vm1239_vm2, %v983_v42 }
 0x232   : > { %v1312_v43 = vpop.f32.mrf.mxu0 }
 0x233   : > { %v1319_v57 = vmul.f32 0.35355338, %v1312_v43 }
 0x235   : > { %v1323_v62 = vadd.f32 %v1319_v57, %v861_v46 }
 0x236   : > { %v1255_v44 = vpop.f32.mrf.mxu1 }
 0x237   : > { %v1316_v45 = vmul.f32 0.35355338, %v1255_v44  ;;  %v1333_v63 = vsel %vm1239_vm2, %v1323_v62, -inf }
 0x239   : > { %v1320_v47 = vadd.f32 %v1316_v45, %v861_v46 }
 0x23a   : > { %v1274_v48 = vpop.f32.mrf.mxu2  ;;  %v1293_v49 = vpop.f32.mrf.mxu3 }
 0x23b   : > { %v1317_v50 = vmul.f32 0.35355338, %v1274_v48  ;;  %v1318_v51 = vmul.f32 0.35355338, %v1293_v49  ;;  %v1314_v52 = vpop.f32.mrf.mxu0  ;;  %v1324_v53 = vsel %vm1239_vm2, %v1320_v47, -inf }
 0x23c   : > { %1325 = vmax.xlane.f32.xlu1 %v1324_v53 }
 0x23d   : > { %v1322_v54 = vadd.f32 %v1318_v51, %v861_v46  ;;  %v1321_v55 = vadd.f32 %v1317_v50, %v861_v46 }
 0x23e   : > { %v1257_v56 = vpop.f32.mrf.mxu1 }
 0x23f   : > { %v1330_v58 = vsel %vm1239_vm2, %v1322_v54, -inf  ;;  %v1327_v59 = vsel %vm1239_vm2, %v1321_v55, -inf }
 0x240   : > { %1331 = vmax.xlane.f32.xlu2 %v1330_v58  ;;  %1328 = vmax.xlane.f32.xlu0 %v1327_v59 }
 0x242   : > { %v1276_v60 = vpop.f32.mrf.mxu2  ;;  %v1295_v61 = vpop.f32.mrf.mxu3 }
 0x248   : > { %1334 = vmax.xlane.f32.xlu2 %v1333_v63 }
 0x254   : > { %3184 = vrot.lane.b32.xlu0 %v3537_v12, %s3322_s28 }
 0x260   : > { %3179 = vrot.lane.b32.xlu2 %v3533_v9, %s3322_s28  ;;  %s4282_s28 = sld [smem:[#allocation20_spill]] }
 0x2af   : > { %v1326_v7 = vpop.xlane.xlu1 %1325 }
 0x2b0   : > { %v1336_v13 = vsub.f32 %v1320_v47, %v1326_v7 }
 0x2b2   : > { %v1340_v9 = vmul.f32 1.442695, %v1336_v13 }
 0x2b3   : > { %v1332_v0 = vpop.xlane.xlu2 %1331  ;;  %v1329_v1 = vpop.xlane.xlu0 %1328 }
 0x2b4   : > { %v1338_v3 = vsub.f32 %v1322_v54, %v1332_v0  ;;  %v1337_v5 = vsub.f32 %v1321_v55, %v1329_v1 }
 0x2b6   : > { %v1344_v4 = vmul.f32 1.442695, %v1338_v3  ;;  %v1342_v6 = vmul.f32 1.442695, %v1337_v5 }
 0x2b8   : > { %3212 = vpow2.f32 %v1344_v4 }
 0x2b9   : > { %3214 = vpow2.f32 %v1342_v6 }
 0x2bb   : > { %v1335_v8 = vpop.xlane.xlu2 %1334 }
 0x2bc   : > { %v1339_v10 = vsub.f32 %v1323_v62, %v1335_v8 }
 0x2be   : > { %v3643_v11 = vpop.eup %3212  ;;  %v1346_v14 = vmul.f32 1.442695, %v1339_v10 }
 0x2bf   : > { %v1354_v12 = vsel %vm1239_vm2, %v3643_v11, 0.0  ;;  %v3647_v16 = vpop.eup %3214 }
 0x2c0   : > { %3216 = vpow2.f32 %v1346_v14  ;;  %1355 = vadd.xlane.f32.xlu1 %v1354_v12  ;;  %v1351_v27 = vsel %vm1239_vm2, %v3647_v16, 0.0 }
 0x2c1   : > { %3218 = vpow2.f32 %v1340_v9 }
 0x2c3   : > { %v3180_v15 = vpop.permute.xlu2 %3179 }
 0x2c4   : > { %v3182_v17 = vunpack.i.h.bf16 %v3180_v15  ;;  %v3181_v18 = vunpack.i.l.bf16 %v3180_v15 }
 0x2c6   : > { %v3649_v20 = vpop.eup %3216  ;;  %v1139_v21 = vrot.slane %v3182_v17, 4  ;;  %v1127_v22 = vrot.slane %v3181_v18, 4  ;;  %v3185_v23 = vpop.permute.xlu0 %3184 }
 0x2c7   : > { %v3187_v24 = vunpack.i.h.bf16 %v3185_v23  ;;  %v3186_v25 = vunpack.i.l.bf16 %v3185_v23  ;;  %v1357_v26 = vsel %vm1239_vm2, %v3649_v20, 0.0  ;;  %v3661_v37 = vpop.eup %3218 }
 0x2c8   : > { %1358 = vadd.xlane.f32.xlu0 %v1357_v26  ;;  %1352 = vadd.xlane.f32.xlu1 %v1351_v27  ;;  %v1348_v48 = vsel %vm1239_vm2, %v3661_v37, 0.0 }
 0x2c9   : > { %v1137_v28 = vrot.slane %v3187_v24, 4  ;;  %v1140_v29 = vsel %vm873_vm1, %v3187_v24, %v1139_v21  ;;  %v1125_v30 = vrot.slane %v3186_v25, 4  ;;  %v1128_v31 = vsel %vm873_vm1, %v3186_v25, %v1127_v22 }
 0x2ca   : > { %v1148_v32 = vperm.slane %v1140_v29, %v3543_v19  ;;  %v1136_v33 = vperm.slane %v1128_v31, %v3543_v19 }
 0x2cb   : > { %v1138_v35 = vsel %vm873_vm1, %v1137_v28, %v3182_v17  ;;  %v1126_v36 = vsel %vm873_vm1, %v1125_v30, %v3181_v18 }
 0x2cc   : > { %v1144_v38 = vperm.slane %v1138_v35, %v3543_v19  ;;  %v1161_v39 = vrot.slane %v1148_v32, 4  ;;  %v1132_v40 = vperm.slane %v1126_v36, %v3543_v19  ;;  %v1163_v41 = vrot.slane %v1136_v33, 4 }
 0x2ce   : > { %v1149_v42 = vrot.slane %v1144_v38, 4  ;;  %v1151_v43 = vrot.slane %v1132_v40, 4  ;;  %v1162_v44 = vsel %vm873_vm1, %v1161_v39, %v1136_v33  ;;  %v1164_v45 = vsel %vm873_vm1, %v1148_v32, %v1163_v41 }
 0x2cf   : > { %v1168_v46 = vperm.slane %v1162_v44, %v3553_v34  ;;  %v1172_v47 = vperm.slane %v1164_v45, %v3553_v34 }
 0x2d0   : > { %v1150_v49 = vsel %vm873_vm1, %v1149_v42, %v1132_v40  ;;  %v1152_v50 = vsel %vm873_vm1, %v1144_v38, %v1151_v43  ;;  %1349 = vadd.xlane.f32.xlu1 %v1348_v48 }
 0x2d1   : > { %v1156_v51 = vperm.slane %v1150_v49, %v3553_v34  ;;  %v1160_v52 = vperm.slane %v1152_v50, %v3553_v34  ;;  %v1177_v53 = vrot.slane %v1168_v46, 4  ;;  %v1179_v54 = vrot.slane %v1172_v47, 4 }
 0x2d3   : > { %v1173_v55 = vrot.slane %v1156_v51, 4  ;;  %v1175_v56 = vrot.slane %v1160_v52, 4  ;;  %v1180_v57 = vsel %vm873_vm1, 0.0, %v1179_v54  ;;  %v1192_v58 = vsel %vm873_vm1, %v1179_v54, %v1168_v46 }
 0x2d4   : > { %v1197_v59 = vrot.slane %v1180_v57, 4  ;;  %v1178_v61 = vsel %vm873_vm1, 0.0, %v1177_v53  ;;  %v1196_v63 = vperm.slane %v1192_v58, %v3543_v19 }
 0x2d5   : > { %v1176_v60 = vsel %vm873_vm1, 0.0, %v1175_v56  ;;  %v1181_v62 = vsel %vm873_vm1, %v1175_v56, %v1156_v51  ;;  %v1174_v4 = vsel %vm873_vm1, 0.0, %v1173_v55 }
 0x2d6   : > { %v1186_v0 = vrot.slane %v1176_v60, 4  ;;  %v1185_v1 = vperm.slane %v1181_v62, %v3543_v19  ;;  %v1198_v3 = vsel %vm873_vm1, %v1197_v59, %v1178_v61  ;;  %v1217_v6 = vrot.slane %v1196_v63, 4 }
 0x2d7   : > { %v1202_v5 = vperm.slane %v1198_v3, %v3543_v19 }
 0x2d8   : > { %v1187_v7 = vsel %vm873_vm1, %v1186_v0, %v1174_v4  ;;  %v1205_v8 = vrot.slane %v1185_v1, 4 }
 0x2d9   : > { %v1191_v10 = vperm.slane %v1187_v7, %v3543_v19  ;;  %v1218_v13 = vsel %vm873_vm1, %v1202_v5, %v1217_v6  ;;  %v1215_v14 = vrot.slane %v1202_v5, 4 }
 0x2da   : > { %v1226_v12 = vperm.slane %v1218_v13, %v3553_v34 }
 0x2db   : > { %v1206_v9 = vsel %vm873_vm1, %v1191_v10, %v1205_v8  ;;  %v1203_v15 = vrot.slane %v1191_v10, 4  ;;  %v1216_v17 = vsel %vm873_vm1, %v1215_v14, %v1196_v63 }
 0x2dc   : > { %v1214_v18 = vperm.slane %v1206_v9, %v3553_v34  ;;  %v1231_v21 = vrot.slane %v1226_v12, 4  ;;  %v1222_v22 = vperm.slane %v1216_v17, %v3553_v34 }
 0x2dd   : > { %v1204_v23 = vsel %vm873_vm1, %v1203_v15, %v1185_v1 }
 0x2de   : > { %v1232_v24 = vsel %vm873_vm1, %v1231_v21, %v1214_v18  ;;  %v1233_v25 = vrot.slane %v1214_v18, 4  ;;  %v1210_v26 = vperm.slane %v1204_v23, %v3553_v34  ;;  %v1227_v27 = vrot.slane %v1222_v22, 4 }
 0x2df   : > { %v1237_v28 = vpack.c.bf16 %v1232_v24, %v1232_v24 }
 0x2e0   : > { %v1228_v29 = vsel %vm873_vm1, %v1227_v27, %v1210_v26  ;;  %v1234_v30 = vsel %vm873_vm1, %v1226_v12, %v1233_v25  ;;  %v1229_v31 = vrot.slane %v1210_v26, 4 }
 0x2e1   : > { %v1467_v32 = vsel %vm1427_vm3, %v1237_v28, 0  ;;  %v1235_v33 = vpack.c.bf16 %v1228_v29, %v1228_v29  ;;  %v1238_v35 = vpack.c.bf16 %v1234_v30, %v1234_v30 }
 0x2e2   : > { %1476 = vmatpush.bf16.msrb.mxu3 %v1467_v32  ;;  %v1230_v36 = vsel %vm873_vm1, %v1222_v22, %v1229_v31 }
 0x2e3   : > { %v1429_v38 = vsel %vm1427_vm3, %v1235_v33, 0  ;;  %v1486_v39 = vsel %vm1427_vm3, %v1238_v35, 0  ;;  %v1236_v40 = vpack.c.bf16 %v1230_v36, %v1230_v36 }
 0x2e4   : > { %1438 = vmatpush.bf16.msrb.mxu1 %v1429_v38  ;;  %1495 = vmatpush.bf16.msra.mxu0 %v1486_v39 }
 0x2e5   : > { %v1448_v41 = vsel %vm1427_vm3, %v1236_v40, 0 }
 0x2e6   : > { %1457 = vmatpush.bf16.msrb.mxu2 %v1448_v41 }
 0x333   : > { %v1356_v42 = vpop.xlane.xlu1 %1355 }
 0x334   : > { %3220 = vrcp.f32 %v1356_v42  ;;  %v1401_v49 = vand.u32 2147483648, %v1356_v42  ;;  %v1399_v50 = vand.u32 2147483647, %v1356_v42  ;;  %vm1395_vm5 = vweird.f32 %v1356_v42 }
 0x336   : > { %v1402_v54 = vor.u32 1.1754944e-38, %v1401_v49  ;;  %vm1400_vm7 = vcmp.eq.f32.partialorder %v1399_v50, 8.507059e+37 }
 0x33a   : > { %v3221_v43 = vpop.eup %3220 }
 0x33b   : > { %v1391_v44 = vmul.f32 %v3221_v43, %v1356_v42  ;;  %v1359_v45 = vpop.xlane.xlu0 %1358  ;;  %v1353_v46 = vpop.xlane.xlu1 %1352  ;;  %vm1396_vm4 = vweird.f32 %v3221_v43 }
 0x33c   : > { %3222 = vrcp.f32 %v1359_v45  ;;  %vm1397_vm6 = vmor %vm1395_vm5, %vm1396_vm4  ;;  %v1416_v61 = vand.u32 2147483648, %v1359_v45  ;;  %v1414_v1 = vand.u32 2147483647, %v1359_v45  ;;  %v1386_v3 = vand.u32 2147483648, %v1353_v46 }
 0x33d   : > { %v1392_v47 = vsub.f32 1.0, %v1391_v44  ;;  %3224 = vrcp.f32 %v1353_v46  ;;  %v1384_v5 = vand.u32 2147483647, %v1353_v46  ;;  %vm1410_vm10 = vweird.f32 %v1359_v45 }
 0x33e   : > { %v1417_v10 = vor.u32 1.1754944e-38, %v1416_v61  ;;  %vm1380_vm12 = vweird.f32 %v1353_v46  ;;  %vm1415_vm13 = vcmp.eq.f32.partialorder %v1414_v1, 8.507059e+37 }
 0x33f   : > { %v1393_v48 = vmul.f32 %v3221_v43, %v1392_v47  ;;  %vm1385_vm15 = vcmp.eq.f32.partialorder %v1384_v5, 8.507059e+37 }
 0x341   : > { %v1394_v51 = vadd.f32 %v3221_v43, %v1393_v48 }
 0x342   : > { %v3223_v52 = vpop.eup %3222 }
 0x343   : > { %v3225_v53 = vpop.eup %3224  ;;  %v1406_v55 = vmul.f32 %v3223_v52, %v1359_v45  ;;  %v1350_v56 = vpop.xlane.xlu1 %1349  ;;  %v1398_v57 = vsel %vm1397_vm6, %v3221_v43, %v1394_v51  ;;  %vm1411_vm8 = vweird.f32 %v3223_v52 }
 0x344   : > { %v1376_v58 = vmul.f32 %v3225_v53, %v1353_v46  ;;  %3226 = vrcp.f32 %v1350_v56  ;;  %v1403_v60 = vsel %vm1400_vm7, %v1402_v54, %v1398_v57  ;;  %vm1381_vm9 = vweird.f32 %v3225_v53  ;;  %vm1412_vm11 = vmor %vm1410_vm10, %vm1411_vm8 }
 0x345   : > { %v1407_v59 = vsub.f32 1.0, %v1406_v55  ;;  %v1404_v63 = vmul.f32 %v3643_v11, %v1403_v60  ;;  %vm1382_vm14 = vmor %vm1380_vm12, %vm1381_vm9  ;;  %v1387_v11 = vor.u32 1.1754944e-38, %v1386_v3  ;;  %v1371_v22 = vand.u32 2147483648, %v1350_v56 }
 0x346   : > { %v1377_v62 = vsub.f32 1.0, %v1376_v58  ;;  %v1369_v25 = vand.u32 2147483647, %v1350_v56  ;;  %vm1365_vm5 = vweird.f32 %v1350_v56  ;;  %vm1624_vm8 = vcmask 130048  }
 0x347   : > { %v1408_v0 = vmul.f32 %v3223_v52, %v1407_v59  ;;  %v1422_v6 = vpack.c.bf16 %v1404_v63, %v1404_v63  ;;  %v1372_v29 = vor.u32 1.1754944e-38, %v1371_v22  ;;  %vm1626_vm9 = vcmask 195584  }
 0x348   : > { %v1378_v4 = vmul.f32 %v3225_v53, %v1377_v62  ;;  %vm1370_vm7 = vcmp.eq.f32.partialorder %v1369_v25, 8.507059e+37 }
 0x349   : > { %v1409_v7 = vadd.f32 %v3223_v52, %v1408_v0  ;;  %3026 = vmatmul.msk.bf16.vlgmr.msrb.gmra.mxu3 %vm1239_vm2, %v1422_v6 }
 0x34a   : > { %v3227_v8 = vpop.eup %3226  ;;  %v1379_v13 = vadd.f32 %v3225_v53, %v1378_v4 }
 0x34b   : > { %v1413_v14 = vsel %vm1412_vm11, %v3223_v52, %v1409_v7  ;;  %v1361_v12 = vmul.f32 %v3227_v8, %v1350_v56  ;;  %vm1366_vm4 = vweird.f32 %v3227_v8 }
 0x34c   : > { %v1418_v9 = vsel %vm1415_vm13, %v1417_v10, %v1413_v14  ;;  %v1383_v15 = vsel %vm1382_vm14, %v3225_v53, %v1379_v13  ;;  %vm1367_vm6 = vmor %vm1365_vm5, %vm1366_vm4 }
 0x34d   : > { %v1419_v17 = vmul.f32 %v3649_v20, %v1418_v9  ;;  %v1362_v18 = vsub.f32 1.0, %v1361_v12  ;;  %v1388_v21 = vsel %vm1385_vm15, %v1387_v11, %v1383_v15 }
 0x34e   : > { %v1389_v23 = vmul.f32 %v3647_v16, %v1388_v21 }
 0x34f   : > { %v1363_v24 = vmul.f32 %v3227_v8, %v1362_v18  ;;  %v1423_v26 = vpack.c.bf16 %v1419_v17, %v1419_v17 }
 0x350   : > { %v1421_v27 = vpack.c.bf16 %v1389_v23, %v1389_v23 }
 0x351   : > { %v1364_v28 = vadd.f32 %v3227_v8, %v1363_v24  ;;  %3027 = vmatmul.msk.bf16.vlgmr.msra.gmra.mxu0 %vm1239_vm2, %v1423_v26 }
 0x352   : > { %3025 = vmatmul.msk.bf16.vlgmr.msrb.gmra.mxu2 %vm1239_vm2, %v1421_v27 }
 0x353   : > { %v1368_v20 = vsel %vm1367_vm6, %v3227_v8, %v1364_v28 }
 0x354   : > { %v1373_v30 = vsel %vm1370_vm7, %v1372_v29, %v1368_v20 }
 0x355   : > { %v1374_v31 = vmul.f32 %v3661_v37, %v1373_v30 }
 0x357   : > { %v1420_v32 = vpack.c.bf16 %v1374_v31, %v1374_v31 }
 0x359   : > { %3024 = vmatmul.msk.bf16.vlgmr.msrb.gmra.mxu1 %vm1239_vm2, %v1420_v32 }
 0x3cc   : > { %v1478_v16 = vpop.f32.mrf.mxu3 }
 0x3cd   : > { %v1501_v36 = vrot.slane %v1478_v16, 4 }
 0x3ce   : > { %v1497_v33 = vpop.f32.mrf.mxu0 }
 0x3cf   : > { %v1513_v35 = vrot.slane %v1497_v33, 4 }
 0x3d4   : > { %v1480_v39 = vpop.f32.mrf.mxu3 }
 0x3d5   : > { %v1459_v38 = vpop.f32.mrf.mxu2 }
 0x3d6   : > { %v1514_v40 = vsel %vm873_vm1, %v1513_v35, %v1459_v38  ;;  %v1515_v41 = vrot.slane %v1459_v38, 4  ;;  %v1440_v42 = vpop.f32.mrf.mxu1  ;;  %v1499_v43 = vpop.f32.mrf.mxu0 }
 0x3d7   : > { %v1520_v44 = vperm.slane %v1514_v40, %v3543_v19  ;;  %v1502_v45 = vsel %vm873_vm1, %v1501_v36, %v1440_v42  ;;  %v1503_v46 = vrot.slane %v1440_v42, 4  ;;  %v3105_v43 = vld [vmem:[%s4274_s1 + $0x8] sm:$0xff] }
 0x3d8   : > { %v1516_v37 = vsel %vm873_vm1, %v1497_v33, %v1515_v41  ;;  %v1508_v47 = vperm.slane %v1502_v45, %v3543_v19  ;;  %1658 = vmatpush.bf16.msra.mxu1 %v3105_v43 }
 0x3d9   : > { %v1524_v48 = vperm.slane %v1516_v37, %v3543_v19  ;;  %v1525_v49 = vrot.slane %v1520_v44, 4  ;;  %v1504_v50 = vsel %vm873_vm1, %v1478_v16, %v1503_v46 }
 0x3da   : > { %v1512_v51 = vperm.slane %v1504_v50, %v3543_v19  ;;  %v1527_v52 = vrot.slane %v1508_v47, 4 }
 0x3db   : > { %v1537_v53 = vrot.slane %v1524_v48, 4  ;;  %v1526_v54 = vsel %vm873_vm1, %v1525_v49, %v1508_v47 }
 0x3dc   : > { %v1528_v55 = vsel %vm873_vm1, %v1520_v44, %v1527_v52  ;;  %v1532_v56 = vperm.slane %v1526_v54, %v3553_v34  ;;  %v1539_v57 = vrot.slane %v1512_v51, 4  ;;  %v3104_v44 = vld [vmem:[%s4274_s1] sm:$0xff]  ;;  %s807_s1 = scalar_lea.vmem %s4276_s0, %s3516_s27  ;;  %s4281_s0 = sld [smem:[#allocation19_spill]] }
 0x3dd   : > { %v1536_v58 = vperm.slane %v1528_v55, %v3553_v34  ;;  %v1538_v59 = vsel %vm873_vm1, %v1537_v53, %v1512_v51  ;;  %v1461_v60 = vpop.f32.mrf.mxu2  ;;  %1659 = vmatpush.bf16.msra.mxu1 %v3104_v44  ;;  %v3109_v51 = vld [vmem:[%s4213_s12 + $0x8] sm:$0xff] }
 0x3de   : > { %v1540_v61 = vsel %vm873_vm1, %v1524_v48, %v1539_v57  ;;  %v1544_v62 = vperm.slane %v1538_v59, %v3553_v34  ;;  %v1442_v63 = vpop.f32.mrf.mxu1  ;;  %v1549_v1 = vrot.slane %v1532_v56, 4  ;;  %1771 = vmatpush.bf16.msra.mxu3 %v3109_v51  ;;  %v821_v59 = vld [vmem:[%s807_s1] sm:$0xff]  ;;  %s4277_s1 = smov 120  }
 0x3df   : > { %v1548_v0 = vperm.slane %v1540_v61, %v3553_v34  ;;  %v1551_v3 = vrot.slane %v1536_v58, 4  ;;  %v3108_v58 = vld [vmem:[%s4213_s12] sm:$0xff]  ;;  %v822_v60 = vpack.c.bf16 %v821_v59, %v821_v59  ;;  %v3326_v61 = vmov 32.0  }
 0x3e0   : > { %v1553_v5 = vrot.slane %v1544_v62, 4  ;;  %v1550_v13 = vsel %vm873_vm1, 0.0, %v1549_v1  ;;  %3228 = vrcp.f32 %v3326_v61 }
 0x3e1   : > { %v1552_v4 = vsel %vm873_vm1, 0.0, %v1551_v3  ;;  %v1555_v6 = vrot.slane %v1548_v0, 4  ;;  %v1557_v7 = vsel %vm873_vm1, %v1551_v3, %v1532_v56 }
 0x3e2   : > { %v1562_v8 = vrot.slane %v1552_v4, 4  ;;  %v1561_v10 = vperm.slane %v1557_v7, %v3543_v19  ;;  %v1554_v17 = vsel %vm873_vm1, 0.0, %v1553_v5  ;;  %1772 = vmatpush.bf16.msra.mxu3 %v3108_v58 }
 0x3e3   : > { %v1556_v14 = vsel %vm873_vm1, 0.0, %v1555_v6  ;;  %v1568_v11 = vsel %vm873_vm1, %v1555_v6, %v1544_v62 }
 0x3e4   : > { %v1573_v12 = vrot.slane %v1556_v14, 4  ;;  %v1563_v9 = vsel %vm873_vm1, %v1562_v8, %v1550_v13  ;;  %v1572_v15 = vperm.slane %v1568_v11, %v3543_v19  ;;  %v1581_v21 = vrot.slane %v1561_v10, 4  ;;  %v3107_v11 = vld [vmem:[%s4279_s10 + $0x8] sm:$0xff] }
 0x3e5   : > { %v1567_v18 = vperm.slane %v1563_v9, %v3543_v19  ;;  %3054 = vmatmul.msk.bf16.vlgmr.msra.gmra.mxu3 %vm844_vm0, %v822_v60  ;;  %1735 = vmatpush.bf16.msra.mxu2 %v3107_v11  ;;  %v3106_v9 = vld [vmem:[%s4279_s10] sm:$0xff] }
 0x3e6   : > { %v1574_v22 = vsel %vm873_vm1, %v1573_v12, %v1554_v17  ;;  %v1593_v23 = vrot.slane %v1572_v15, 4 }
 0x3e7   : > { %v1578_v24 = vperm.slane %v1574_v22, %v3543_v19  ;;  %v1579_v25 = vrot.slane %v1567_v18, 4  ;;  %v1582_v26 = vsel %vm873_vm1, %v1567_v18, %v1581_v21 }
 0x3e8   : > { %v1590_v32 = vperm.slane %v1582_v26, %v3553_v34 }
 0x3e9   : > { %v1594_v27 = vsel %vm873_vm1, %v1578_v24, %v1593_v23  ;;  %v1580_v28 = vsel %vm873_vm1, %v1579_v25, %v1561_v10  ;;  %v1591_v29 = vrot.slane %v1578_v24, 4  ;;  %v3202_v10 = vld [vmem:[%s4214_s13] ss:$0 sm:$0xff]  ;;  %1736 = vmatpush.bf16.msra.mxu2 %v3106_v9 }
 0x3ea   : > { %v1602_v20 = vperm.slane %v1594_v27, %v3553_v34  ;;  %v1586_v30 = vperm.slane %v1580_v28, %v3553_v34  ;;  %v1609_v41 = vrot.slane %v1590_v32, 4  ;;  %v3200_v27 = vld [vmem:[%s4281_s0] ss:$0 sm:$0xff]  ;;  %s4285_s0 = smov 16  }
 0x3eb   : > { %v1592_v31 = vsel %vm873_vm1, %v1591_v29, %v1572_v15  ;;  %v3201_v29 = vld [vmem:[%s4282_s28] ss:$0 sm:$0xff] }
 0x3ec   : > { %v1607_v16 = vrot.slane %v1602_v20, 4  ;;  %v1598_v33 = vperm.slane %v1592_v31, %v3553_v34  ;;  %v1605_v35 = vrot.slane %v1586_v30, 4  ;;  %v1610_v42 = vsel %vm873_vm1, %v1602_v20, %v1609_v41 }
 0x3ee   : > { %v1608_v36 = vsel %vm873_vm1, %v1607_v16, %v1590_v32  ;;  %v1603_v38 = vrot.slane %v1598_v33, 4  ;;  %v1606_v39 = vsel %vm873_vm1, %v1598_v33, %v1605_v35 }
 0x3ef   : > { %1616 = vrot.lane.b32.xlu1 %v1608_v36, %s4246_s9  ;;  %1612 = vrot.lane.b32.xlu2 %v1606_v39, %s4244_s5  ;;  %s4278_s9 = smov 112   ;;  %s4286_s5 = smov 8  }
 0x3f0   : > { %v1604_v40 = vsel %vm873_vm1, %v1603_v38, %v1586_v30 }
 0x3f7   : > { %1620 = vrot.lane.b32.xlu2 %v1610_v42, %s4242_s3  ;;  %s4275_s3 = sld [smem:[#allocation18_spill]] }
 0x3fd   : > { %v3199_v52 = vld [vmem:[%s4275_s3] ss:$0 sm:$0xff]  ;;  %s4287_s3 = smov 24  }
 0x449   : > { %v1613_v45 = vpop.permute.xlu2 %1612 }
 0x44a   : > { %v1623_v46 = vsel %vm1239_vm2, %v1604_v40, %v1613_v45 }
 0x451   : > { %v1621_v47 = vpop.permute.xlu2 %1620 }
 0x461   : > { %v1617_v37 = vpop.permute.xlu1 %1616 }
 0x462   : > { %v1625_v48 = vsel %vm1624_vm8, %v1623_v46, %v1617_v37 }
 0x463   : > { %v1627_v49 = vsel %vm1626_vm9, %v1625_v48, %v1621_v47 }
 0x464   : > { %v1628_v50 = vpack.c.bf16 %v1627_v49, %v1627_v49 }
 0x466   : > { %3036 = vmatmul.msk.bf16.vlgmr.msra.gmra.mxu1 %vm844_vm0, %v1628_v50 }
 0x468   : > { %v1774_v13 = vpop.f32.mrf.mxu3 }
 0x469   : > { %v3787_v14 = vadd.f32 %v3202_v10, %v1774_v13 }
 0x46b   : > { %1904 = vrot.lane.b32.xlu0 %v3787_v14, %s4277_s1  ;;  %v1915_v33 = vrot.slane %v3787_v14, 4 }
 0x470   : > { %v1776_v12 = vpop.f32.mrf.mxu3 }
 0x473   : > { %1910 = vrot.lane.b32.xlu0 %v3787_v14, %s4280_s29 }
 0x4dd   : > { %v3817_v36 = vpop.permute.xlu0 %1904 }
 0x4de   : > { %v1927_v41 = vrot.slane %v3817_v36, 4 }
 0x4e3   : > { %v1661_v53 = vpop.f32.mrf.mxu1 }
 0x4e4   : > { %v1662_v54 = vadd.f32 %v3199_v52, %v1661_v53 }
 0x4e5   : > { %v3826_v44 = vpop.permute.xlu0 %1910 }
 0x4e6   : > { %v1665_v55 = vadd.f32 %v1662_v54, %v3522_v2  ;;  %v3229_v2 = vpop.eup %3228  ;;  %v1925_v45 = vrot.slane %v3826_v44, 4  ;;  %v1928_v46 = vsel %vm873_vm1, %v3826_v44, %v1927_v41 }
 0x4e7   : > { %v1670_v62 = vmul.f32 32.0, %v3229_v2  ;;  %vm1674_vm10 = vweird.f32 %v3229_v2  ;;  %v1936_v47 = vperm.slane %v1928_v46, %v3543_v19 }
 0x4e8   : > { %v1666_v56 = vsel %vm844_vm0, %v1665_v55, 0.0  ;;  %v1926_v48 = vsel %vm873_vm1, %v1925_v45, %v3817_v36 }
 0x4e9   : > { %1667 = vadd.xlane.f32.xlu2 %v1666_v56  ;;  %v1671_v63 = vsub.f32 1.0, %v1670_v62  ;;  %v1932_v49 = vperm.slane %v1926_v48, %v3543_v19  ;;  %v1949_v50 = vrot.slane %v1936_v47, 4 }
 0x4eb   : > { %v1663_v57 = vpop.f32.mrf.mxu1  ;;  %v1672_v0 = vmul.f32 %v3229_v2, %v1671_v63  ;;  %v1937_v53 = vrot.slane %v1932_v49, 4 }
 0x4ed   : > { %v1673_v1 = vadd.f32 %v3229_v2, %v1672_v0 }
 0x4ef   : > { %v3780_v3 = vsel %vm1674_vm10, %v3229_v2, %v1673_v1 }
 0x501   : > { %1907 = vrot.lane.b32.xlu2 %v3787_v14, %s4278_s9 }
 0x55c   : > { %v1668_v4 = vpop.xlane.xlu2 %1667 }
 0x55d   : > { %v1676_v5 = vmul.f32 %v3780_v3, %v1668_v4 }
 0x55f   : > { %v1677_v6 = vsub.f32 %v1665_v55, %v1676_v5 }
 0x561   : > { %v1678_v7 = vmul.f32 %v1677_v6, %v1677_v6 }
 0x563   : > { %v1679_v8 = vsel %vm844_vm0, %v1678_v7, 0.0 }
 0x564   : > { %1680 = vadd.xlane.f32.xlu1 %v1679_v8  ;;  %v3813_v16 = vpop.permute.xlu2 %1907 }
 0x565   : > { %v1913_v35 = vrot.slane %v3813_v16, 4  ;;  %v1916_v38 = vsel %vm873_vm1, %v3813_v16, %v1915_v33 }
 0x566   : > { %v1924_v40 = vperm.slane %v1916_v38, %v3543_v19 }
 0x567   : > { %v1914_v39 = vsel %vm873_vm1, %v1913_v35, %v3787_v14 }
 0x568   : > { %v1920_v42 = vperm.slane %v1914_v39, %v3543_v19  ;;  %v1951_v43 = vrot.slane %v1924_v40, 4  ;;  %v1950_v55 = vsel %vm873_vm1, %v1949_v50, %v1924_v40  ;;  %v3203_v50 = vld [vmem:[%s4212_s11] ss:$0 sm:$0xff] }
 0x569   : > { %v1956_v57 = vperm.slane %v1950_v55, %v3553_v34 }
 0x56a   : > { %v1939_v37 = vrot.slane %v1920_v42, 4  ;;  %v1952_v51 = vsel %vm873_vm1, %v1936_v47, %v1951_v43  ;;  %v1938_v59 = vsel %vm873_vm1, %v1937_v53, %v1920_v42 }
 0x56b   : > { %v1960_v52 = vperm.slane %v1952_v51, %v3553_v34  ;;  %v1944_v60 = vperm.slane %v1938_v59, %v3553_v34  ;;  %v1965_v2 = vrot.slane %v1956_v57, 4 }
 0x56c   : > { %v1940_v54 = vsel %vm873_vm1, %v1932_v49, %v1939_v37 }
 0x56d   : > { %v1948_v56 = vperm.slane %v1940_v54, %v3553_v34  ;;  %v1967_v58 = vrot.slane %v1960_v52, 4  ;;  %v1961_v1 = vrot.slane %v1944_v60, 4  ;;  %v1966_v5 = vsel %vm873_vm1, 0.0, %v1965_v2 }
 0x56f   : > { %v1963_v61 = vrot.slane %v1948_v56, 4  ;;  %v1968_v62 = vsel %vm873_vm1, 0.0, %v1967_v58  ;;  %v1980_v63 = vsel %vm873_vm1, %v1967_v58, %v1956_v57  ;;  %v1962_v8 = vsel %vm873_vm1, 0.0, %v1961_v1 }
 0x570   : > { %v1985_v0 = vrot.slane %v1968_v62, 4  ;;  %v1984_v10 = vperm.slane %v1980_v63, %v3543_v19 }
 0x571   : > { %v1964_v4 = vsel %vm873_vm1, 0.0, %v1963_v61 }
 0x572   : > { %v1986_v7 = vsel %vm873_vm1, %v1985_v0, %v1966_v5 }
 0x573   : > { %v1990_v13 = vperm.slane %v1986_v7, %v3543_v19 }
 0x575   : > { %v2003_v9 = vrot.slane %v1990_v13, 4 }
 0x5d7   : > { %v1681_v15 = vpop.xlane.xlu1 %1680 }
 0x5d8   : > { %v1682_v17 = vmul.f32 %v1681_v15, %v3780_v3  ;;  %v1969_v15 = vsel %vm873_vm1, %v1963_v61, %v1944_v60 }
 0x5da   : > { %v1683_v18 = vadd.f32 1e-05, %v1682_v17  ;;  %v1973_v17 = vperm.slane %v1969_v15, %v3543_v19 }
 0x5dc   : > { %3230 = vrsqrt.f32 %v1683_v18  ;;  %vm1690_vm12 = vweird.f32 %v1683_v18 }
 0x5e2   : > { %v3231_v21 = vpop.eup %3230 }
 0x5e3   : > { %v1685_v22 = vmul.f32 %v3231_v21, %v1683_v18  ;;  %vm1691_vm11 = vweird.f32 %v3231_v21 }
 0x5e4   : > { %vm1692_vm13 = vmor %vm1690_vm12, %vm1691_vm11 }
 0x5e5   : > { %v1686_v23 = vmul.f32 %v3231_v21, %v1685_v22  ;;  %v2005_v22 = vrot.slane %v1984_v10, 4 }
 0x5e7   : > { %v1687_v24 = vmul.f32 0.5, %v1686_v23 }
 0x5e9   : > { %v1688_v25 = vsub.f32 1.5, %v1687_v24 }
 0x5eb   : > { %v1689_v26 = vmul.f32 %v3231_v21, %v1688_v25  ;;  %v1993_v25 = vrot.slane %v1973_v17, 4 }
 0x5ed   : > { %v1693_v28 = vsel %vm1692_vm13, %v3231_v21, %v1689_v26  ;;  %v2004_v21 = vsel %vm873_vm1, %v2003_v9, %v1984_v10  ;;  %v2006_v26 = vsel %vm873_vm1, %v1990_v13, %v2005_v22 }
 0x5ee   : > { %v1694_v20 = vmul.f32 %v1693_v28, %v1677_v6  ;;  %v1974_v6 = vrot.slane %v1964_v4, 4  ;;  %v2010_v23 = vperm.slane %v2004_v21, %v3553_v34 }
 0x5f0   : > { %v1699_v30 = vmul.f32 %v3200_v27, %v1694_v20  ;;  %v1975_v11 = vsel %vm873_vm1, %v1974_v6, %v1962_v8  ;;  %v2015_v28 = vrot.slane %v2010_v23, 4 }
 0x5f1   : > { %v1979_v12 = vperm.slane %v1975_v11, %v3543_v19 }
 0x5f2   : > { %v3808_v31 = vadd.f32 %v3201_v29, %v1699_v30  ;;  %v2014_v29 = vperm.slane %v2006_v26, %v3553_v34 }
 0x5f3   : > { %v1991_v18 = vrot.slane %v1979_v12, 4  ;;  %v1994_v20 = vsel %vm873_vm1, %v1979_v12, %v1993_v25 }
 0x5f4   : > { %v1705_v32 = vpack.c.bf16 %v3808_v31, %v3808_v31  ;;  %v2002_v33 = vperm.slane %v1994_v20, %v3553_v34  ;;  %v2019_v35 = vrot.slane %v2014_v29, 4 }
 0x5f5   : > { %v1992_v24 = vsel %vm873_vm1, %v1991_v18, %v1973_v17 }
 0x5f6   : > { %3045 = vmatmul.msk.bf16.vlgmr.msra.gmra.mxu2 %vm844_vm0, %v1705_v32  ;;  %v1998_v27 = vperm.slane %v1992_v24, %v3553_v34  ;;  %v2020_v40 = vsel %vm873_vm1, %v2019_v35, %v2002_v33  ;;  %v2021_v41 = vrot.slane %v2002_v33, 4 }
 0x5f7   : > { %v2025_v45 = vpack.c.bf16 %v2020_v40, %v2020_v40 }
 0x5f8   : > { %v2016_v30 = vsel %vm873_vm1, %v2015_v28, %v1998_v27  ;;  %v2017_v32 = vrot.slane %v1998_v27, 4  ;;  %v2022_v46 = vsel %vm873_vm1, %v2014_v29, %v2021_v41 }
 0x5f9   : > { %v2023_v38 = vpack.c.bf16 %v2016_v30, %v2016_v30  ;;  %v2195_v47 = vsel %vm1239_vm2, %v2025_v45, 0  ;;  %v2026_v48 = vpack.c.bf16 %v2022_v46, %v2022_v46 }
 0x5fa   : > { %v2018_v39 = vsel %vm873_vm1, %v2010_v23, %v2017_v32  ;;  %2204 = vmatpush.bf16.xpose.msrb.mxu2 %v2195_v47 }
 0x5fb   : > { %v2157_v42 = vsel %vm1239_vm2, %v2023_v38, 0  ;;  %v2024_v43 = vpack.c.bf16 %v2018_v39, %v2018_v39  ;;  %v2214_v49 = vsel %vm1239_vm2, %v2026_v48, 0 }
 0x5fc   : > { %2166 = vmatpush.bf16.xpose.msrb.mxu0 %v2157_v42  ;;  %2223 = vmatpush.bf16.xpose.msrb.mxu3 %v2214_v49 }
 0x5fd   : > { %v2176_v37 = vsel %vm1239_vm2, %v2024_v43, 0 }
 0x5fe   : > { %2185 = vmatpush.bf16.xpose.msrb.mxu1 %v2176_v37 }
 0x679   : > { %v1738_v51 = vpop.f32.mrf.mxu2 }
 0x67a   : > { %v1739_v52 = vadd.f32 %v3203_v50, %v1738_v51 }
 0x67c   : > { %1783 = vrot.lane.b32.xlu1 %v1739_v52, %s4278_s9  ;;  %1780 = vrot.lane.b32.xlu0 %v1739_v52, %s4277_s1  ;;  %v1791_v57 = vrot.slane %v1739_v52, 4 }
 0x681   : > { %v1740_v53 = vpop.f32.mrf.mxu2 }
 0x684   : > { %1786 = vrot.lane.b32.xlu0 %v1739_v52, %s4280_s29  ;;  %s4283_s29 = sld [smem:[#allocation14_spill]] }
 0x68a   : > { %s814_s30 = scalar_lea.vmem %s4283_s29, %s3513_s8  ;;  %s4284_s8 = smov 96  }
 0x6ee   : > { %v1784_v54 = vpop.permute.xlu1 %1783  ;;  %v1781_v55 = vpop.permute.xlu0 %1780 }
 0x6ef   : > { %v1789_v56 = vrot.slane %v1784_v54, 4  ;;  %v1792_v58 = vsel %vm873_vm1, %v1784_v54, %v1791_v57  ;;  %v1803_v61 = vrot.slane %v1781_v55, 4 }
 0x6f0   : > { %v1800_v60 = vperm.slane %v1792_v58, %v3543_v19 }
 0x6f1   : > { %v1790_v59 = vsel %vm873_vm1, %v1789_v56, %v1739_v52 }
 0x6f2   : > { %v1796_v2 = vperm.slane %v1790_v59, %v3543_v19  ;;  %v1827_v1 = vrot.slane %v1800_v60, 4 }
 0x6f4   : > { %v1815_v6 = vrot.slane %v1796_v2, 4 }
 0x6f6   : > { %v1787_v62 = vpop.permute.xlu0 %1786 }
 0x6f7   : > { %v1801_v63 = vrot.slane %v1787_v62, 4  ;;  %v1804_v0 = vsel %vm873_vm1, %v1787_v62, %v1803_v61 }
 0x6f8   : > { %v1812_v4 = vperm.slane %v1804_v0, %v3543_v19 }
 0x6f9   : > { %v1802_v5 = vsel %vm873_vm1, %v1801_v63, %v1781_v55 }
 0x6fa   : > { %v1808_v7 = vperm.slane %v1802_v5, %v3543_v19  ;;  %v1825_v8 = vrot.slane %v1812_v4, 4  ;;  %v1828_v10 = vsel %vm873_vm1, %v1812_v4, %v1827_v1  ;;  %v3204_v4 = vld [vmem:[%s814_s30] ss:$0 sm:$0xff] }
 0x6fb   : > { %v1836_v13 = vperm.slane %v1828_v10, %v3553_v34 }
 0x6fc   : > { %v1813_v11 = vrot.slane %v1808_v7, 4  ;;  %v1816_v12 = vsel %vm873_vm1, %v1808_v7, %v1815_v6  ;;  %v1826_v9 = vsel %vm873_vm1, %v1825_v8, %v1800_v60 }
 0x6fd   : > { %v1824_v15 = vperm.slane %v1816_v12, %v3553_v34  ;;  %v1832_v17 = vperm.slane %v1826_v9, %v3553_v34  ;;  %v1843_v18 = vrot.slane %v1836_v13, 4 }
 0x6fe   : > { %v1814_v21 = vsel %vm873_vm1, %v1813_v11, %v1796_v2 }
 0x6ff   : > { %v1820_v22 = vperm.slane %v1814_v21, %v3553_v34  ;;  %v1839_v23 = vrot.slane %v1824_v15, 4  ;;  %v1841_v24 = vrot.slane %v1832_v17, 4  ;;  %v1844_v25 = vsel %vm873_vm1, 0.0, %v1843_v18 }
 0x700   : > { %v1856_v26 = vsel %vm873_vm1, %v1843_v18, %v1832_v17  ;;  %v1861_v27 = vrot.slane %v1844_v25, 4 }
 0x701   : > { %v1837_v28 = vrot.slane %v1820_v22, 4  ;;  %v1840_v29 = vsel %vm873_vm1, 0.0, %v1839_v23  ;;  %v1842_v20 = vsel %vm873_vm1, 0.0, %v1841_v24  ;;  %v1845_v30 = vsel %vm873_vm1, %v1839_v23, %v1820_v22 }
 0x702   : > { %v1849_v32 = vperm.slane %v1845_v30, %v3543_v19  ;;  %v1850_v33 = vrot.slane %v1840_v29, 4  ;;  %v1860_v35 = vperm.slane %v1856_v26, %v3543_v19  ;;  %v1862_v38 = vsel %vm873_vm1, %v1861_v27, %v1842_v20 }
 0x703   : > { %v1838_v39 = vsel %vm873_vm1, 0.0, %v1837_v28  ;;  %v1866_v40 = vperm.slane %v1862_v38, %v3543_v19  ;;  %v3188_v29 = vpack.i.bf16 %v3817_v36, %v3787_v14  ;;  %v3193_v20 = vpack.i.bf16 %v3826_v44, %v3813_v16 }
 0x704   : > { %v1851_v41 = vsel %vm873_vm1, %v1850_v33, %v1838_v39  ;;  %v1869_v42 = vrot.slane %v1849_v32, 4  ;;  %v1881_v43 = vrot.slane %v1860_v35, 4 }
 0x705   : > { %v1855_v45 = vperm.slane %v1851_v41, %v3543_v19  ;;  %v1879_v46 = vrot.slane %v1866_v40, 4 }
 0x706   : > { %v1882_v37 = vsel %vm873_vm1, %v1866_v40, %v1881_v43 }
 0x707   : > { %v1880_v47 = vsel %vm873_vm1, %v1879_v46, %v1860_v35  ;;  %v1870_v48 = vsel %vm873_vm1, %v1855_v45, %v1869_v42  ;;  %v1890_v49 = vperm.slane %v1882_v37, %v3553_v34  ;;  %v1867_v50 = vrot.slane %v1855_v45, 4 }
 0x708   : > { %v1878_v51 = vperm.slane %v1870_v48, %v3553_v34  ;;  %v1886_v52 = vperm.slane %v1880_v47, %v3553_v34 }
 0x709   : > { %v1895_v53 = vrot.slane %v1890_v49, 4  ;;  %v1868_v54 = vsel %vm873_vm1, %v1867_v50, %v1849_v32 }
 0x70a   : > { %v1874_v55 = vperm.slane %v1868_v54, %v3553_v34  ;;  %v1891_v56 = vrot.slane %v1886_v52, 4  ;;  %v1897_v57 = vrot.slane %v1878_v51, 4 }
 0x70b   : > { %v1896_v58 = vsel %vm873_vm1, %v1895_v53, %v1878_v51 }
 0x70c   : > { %v1901_v59 = vpack.c.bf16 %v1896_v58, %v1896_v58  ;;  %v1892_v60 = vsel %vm873_vm1, %v1891_v56, %v1874_v55  ;;  %v1898_v61 = vsel %vm873_vm1, %v1890_v49, %v1897_v57  ;;  %v1893_v2 = vrot.slane %v1874_v55, 4 }
 0x70d   : > { %v1899_v62 = vpack.c.bf16 %v1892_v60, %v1892_v60  ;;  %v1902_v63 = vpack.c.bf16 %v1898_v61, %v1898_v61 }
 0x70e   : > { %3057 = vmatmul.msk.bf16.vlgmr.msrb.gmra.mxu2 %vm1239_vm2, %v1901_v59  ;;  %v1894_v0 = vsel %vm873_vm1, %v1886_v52, %v1893_v2 }
 0x70f   : > { %3055 = vmatmul.msk.bf16.vlgmr.msrb.gmra.mxu0 %vm1239_vm2, %v1899_v62  ;;  %3058 = vmatmul.msk.bf16.vlgmr.msrb.gmra.mxu3 %vm1239_vm2, %v1902_v63  ;;  %v1900_v1 = vpack.c.bf16 %v1894_v0, %v1894_v0 }
 0x711   : > { %3056 = vmatmul.msk.bf16.vlgmr.msrb.gmra.mxu1 %vm1239_vm2, %v1900_v1 }
 0x78c   : > { %v2168_v5 = vpop.f32.mrf.mxu0 }
 0x78d   : > { %v2229_v6 = vmul.f32 0.35355338, %v2168_v5 }
 0x78e   : > { %v2187_v7 = vpop.f32.mrf.mxu1 }
 0x78f   : > { %v2236_v8 = vadd.f32 %v3204_v4, %v2229_v6  ;;  %v2230_v21 = vmul.f32 0.35355338, %v2187_v7 }
 0x791   : > { %v2206_v10 = vpop.f32.mrf.mxu2  ;;  %v2240_v13 = vsel %vm1239_vm2, %v2236_v8, -inf  ;;  %v2237_v27 = vadd.f32 %v3204_v4, %v2230_v21 }
 0x792   : > { %v2231_v11 = vmul.f32 0.35355338, %v2206_v10  ;;  %v2225_v12 = vpop.f32.mrf.mxu3  ;;  %2241 = vmax.xlane.f32.xlu1 %v2240_v13 }
 0x793   : > { %v2232_v9 = vmul.f32 0.35355338, %v2225_v12  ;;  %v2243_v28 = vsel %vm1239_vm2, %v2237_v27, -inf }
 0x794   : > { %v2170_v15 = vpop.f32.mrf.mxu0  ;;  %v2238_v17 = vadd.f32 %v3204_v4, %v2231_v11 }
 0x795   : > { %v2239_v18 = vadd.f32 %v3204_v4, %v2232_v9 }
 0x796   : > { %v2246_v22 = vsel %vm1239_vm2, %v2238_v17, -inf  ;;  %v2189_v23 = vpop.f32.mrf.mxu1 }
 0x797   : > { %2247 = vmax.xlane.f32.xlu2 %v2246_v22  ;;  %v2249_v24 = vsel %vm1239_vm2, %v2239_v18, -inf }
 0x798   : > { %2250 = vmax.xlane.f32.xlu0 %v2249_v24 }
 0x799   : > { %v2208_v25 = vpop.f32.mrf.mxu2 }
 0x79a   : > { %v2227_v26 = vpop.f32.mrf.mxu3 }
 0x79f   : > { %2244 = vmax.xlane.f32.xlu2 %v2243_v28 }
 0x7ac   : > { %3189 = vrot.lane.b32.xlu0 %v3188_v29, %s4284_s8 }
 0x7b7   : > { %3194 = vrot.lane.b32.xlu2 %v3193_v20, %s4284_s8 }
 0x805   : > { %v2242_v30 = vpop.xlane.xlu1 %2241 }
 0x806   : > { %v2252_v32 = vsub.f32 %v2236_v8, %v2242_v30 }
 0x808   : > { %v2256_v33 = vmul.f32 1.442695, %v2252_v32 }
 0x80a   : > { %3232 = vpow2.f32 %v2256_v33  ;;  %v2248_v35 = vpop.xlane.xlu2 %2247 }
 0x80b   : > { %v2254_v38 = vsub.f32 %v2238_v17, %v2248_v35  ;;  %v2251_v39 = vpop.xlane.xlu0 %2250 }
 0x80c   : > { %v2255_v41 = vsub.f32 %v2239_v18, %v2251_v39 }
 0x80d   : > { %v2260_v40 = vmul.f32 1.442695, %v2254_v38 }
 0x80e   : > { %v2262_v14 = vmul.f32 1.442695, %v2255_v41 }
 0x80f   : > { %3234 = vpow2.f32 %v2260_v40 }
 0x810   : > { %v3935_v42 = vpop.eup %3232  ;;  %3236 = vpow2.f32 %v2262_v14 }
 0x811   : > { %v2264_v36 = vsel %vm1239_vm2, %v3935_v42, 0.0 }
 0x812   : > { %v2245_v43 = vpop.xlane.xlu2 %2244  ;;  %2265 = vadd.xlane.f32.xlu0 %v2264_v36 }
 0x813   : > { %v2253_v16 = vsub.f32 %v2237_v27, %v2245_v43 }
 0x815   : > { %v3939_v44 = vpop.eup %3234  ;;  %v2258_v46 = vmul.f32 1.442695, %v2253_v16 }
 0x816   : > { %v2270_v45 = vsel %vm1239_vm2, %v3939_v44, 0.0  ;;  %v3943_v47 = vpop.eup %3236 }
 0x817   : > { %2271 = vadd.xlane.f32.xlu1 %v2270_v45  ;;  %3238 = vpow2.f32 %v2258_v46  ;;  %v2273_v51 = vsel %vm1239_vm2, %v3943_v47, 0.0 }
 0x81a   : > { %v3195_v37 = vpop.permute.xlu2 %3194 }
 0x81b   : > { %v3197_v48 = vunpack.i.h.bf16 %v3195_v37  ;;  %v3196_v49 = vunpack.i.l.bf16 %v3195_v37 }
 0x81d   : > { %v2051_v52 = vrot.slane %v3197_v48, 4  ;;  %v2039_v53 = vrot.slane %v3196_v49, 4  ;;  %v3949_v60 = vpop.eup %3238 }
 0x81e   : > { %v3190_v50 = vpop.permute.xlu0 %3189  ;;  %v2267_v6 = vsel %vm1239_vm2, %v3949_v60, 0.0 }
 0x81f   : > { %v3192_v54 = vunpack.i.h.bf16 %v3190_v50  ;;  %v3191_v55 = vunpack.i.l.bf16 %v3190_v50  ;;  %2274 = vadd.xlane.f32.xlu1 %v2273_v51 }
 0x821   : > { %v2053_v56 = vrot.slane %v3192_v54, 4  ;;  %v2040_v57 = vsel %vm873_vm1, %v2039_v53, %v3191_v55  ;;  %v2041_v58 = vrot.slane %v3191_v55, 4  ;;  %v2052_v59 = vsel %vm873_vm1, %v2051_v52, %v3192_v54 }
 0x822   : > { %v2046_v61 = vperm.slane %v2040_v57, %v3543_v19  ;;  %v2058_v2 = vperm.slane %v2052_v59, %v3543_v19 }
 0x823   : > { %v2042_v62 = vsel %vm873_vm1, %v3196_v49, %v2041_v58  ;;  %v2054_v63 = vsel %vm873_vm1, %v3197_v48, %v2053_v56 }
 0x824   : > { %v2050_v0 = vperm.slane %v2042_v62, %v3543_v19  ;;  %v2062_v1 = vperm.slane %v2054_v63, %v3543_v19  ;;  %v2063_v4 = vrot.slane %v2058_v2, 4  ;;  %v2065_v5 = vrot.slane %v2046_v61, 4 }
 0x826   : > { %v2064_v7 = vsel %vm873_vm1, %v2063_v4, %v2046_v61  ;;  %v2066_v8 = vsel %vm873_vm1, %v2058_v2, %v2065_v5  ;;  %v2075_v10 = vrot.slane %v2062_v1, 4  ;;  %v2077_v13 = vrot.slane %v2050_v0, 4 }
 0x827   : > { %v2070_v11 = vperm.slane %v2064_v7, %v3553_v34  ;;  %v2074_v12 = vperm.slane %v2066_v8, %v3553_v34  ;;  %2268 = vadd.xlane.f32.xlu1 %v2267_v6 }
 0x828   : > { %v2076_v9 = vsel %vm873_vm1, %v2075_v10, %v2050_v0  ;;  %v2078_v15 = vsel %vm873_vm1, %v2062_v1, %v2077_v13 }
 0x829   : > { %v2082_v17 = vperm.slane %v2076_v9, %v3553_v34  ;;  %v2086_v18 = vperm.slane %v2078_v15, %v3553_v34  ;;  %v2087_v21 = vrot.slane %v2070_v11, 4  ;;  %v2089_v22 = vrot.slane %v2074_v12, 4 }
 0x82b   : > { %v2090_v23 = vsel %vm873_vm1, 0.0, %v2089_v22  ;;  %v2091_v24 = vrot.slane %v2082_v17, 4  ;;  %v2093_v25 = vrot.slane %v2086_v18, 4  ;;  %v2095_v26 = vsel %vm873_vm1, %v2089_v22, %v2070_v11 }
 0x82c   : > { %v2100_v27 = vrot.slane %v2090_v23, 4  ;;  %v2088_v28 = vsel %vm873_vm1, 0.0, %v2087_v21  ;;  %v2099_v20 = vperm.slane %v2095_v26, %v3543_v19 }
 0x82d   : > { %v2094_v29 = vsel %vm873_vm1, 0.0, %v2093_v25  ;;  %v2106_v30 = vsel %vm873_vm1, %v2093_v25, %v2082_v17  ;;  %v2092_v38 = vsel %vm873_vm1, 0.0, %v2091_v24 }
 0x82e   : > { %v2111_v32 = vrot.slane %v2094_v29, 4  ;;  %v2101_v33 = vsel %vm873_vm1, %v2100_v27, %v2088_v28  ;;  %v2110_v35 = vperm.slane %v2106_v30, %v3543_v19  ;;  %v2119_v40 = vrot.slane %v2099_v20, 4 }
 0x82f   : > { %v2105_v39 = vperm.slane %v2101_v33, %v3543_v19 }
 0x830   : > { %v2112_v41 = vsel %vm873_vm1, %v2111_v32, %v2092_v38  ;;  %v2131_v14 = vrot.slane %v2110_v35, 4 }
 0x831   : > { %v2116_v36 = vperm.slane %v2112_v41, %v3543_v19  ;;  %v2120_v43 = vsel %vm873_vm1, %v2105_v39, %v2119_v40  ;;  %v2117_v16 = vrot.slane %v2105_v39, 4 }
 0x832   : > { %v2128_v45 = vperm.slane %v2120_v43, %v3553_v34 }
 0x833   : > { %v2132_v46 = vsel %vm873_vm1, %v2116_v36, %v2131_v14  ;;  %v2118_v37 = vsel %vm873_vm1, %v2117_v16, %v2099_v20  ;;  %v2129_v48 = vrot.slane %v2116_v36, 4 }
 0x834   : > { %v2140_v49 = vperm.slane %v2132_v46, %v3553_v34  ;;  %v2147_v50 = vrot.slane %v2128_v45, 4  ;;  %v2124_v51 = vperm.slane %v2118_v37, %v3553_v34 }
 0x835   : > { %v2130_v52 = vsel %vm873_vm1, %v2129_v48, %v2110_v35 }
 0x836   : > { %v2148_v53 = vsel %vm873_vm1, %v2140_v49, %v2147_v50  ;;  %v2136_v54 = vperm.slane %v2130_v52, %v3553_v34  ;;  %v2143_v55 = vrot.slane %v2124_v51, 4  ;;  %v2145_v56 = vrot.slane %v2140_v49, 4 }
 0x837   : > { %v2152_v57 = vpack.c.bf16 %v2148_v53, %v2148_v53 }
 0x838   : > { %v2144_v58 = vsel %vm873_vm1, %v2136_v54, %v2143_v55  ;;  %v2146_v59 = vsel %vm873_vm1, %v2145_v56, %v2128_v45  ;;  %v2141_v61 = vrot.slane %v2136_v54, 4 }
 0x839   : > { %v2401_v2 = vsel %vm1427_vm3, %v2152_v57, 0  ;;  %v2150_v62 = vpack.c.bf16 %v2144_v58, %v2144_v58  ;;  %v2151_v63 = vpack.c.bf16 %v2146_v59, %v2146_v59 }
 0x83a   : > { %2410 = vmatpush.bf16.msra.mxu3 %v2401_v2  ;;  %v2142_v0 = vsel %vm873_vm1, %v2141_v61, %v2124_v51 }
 0x83b   : > { %v2363_v1 = vsel %vm1427_vm3, %v2150_v62, 0  ;;  %v2382_v4 = vsel %vm1427_vm3, %v2151_v63, 0  ;;  %v2149_v5 = vpack.c.bf16 %v2142_v0, %v2142_v0 }
 0x83c   : > { %2372 = vmatpush.bf16.msra.mxu1 %v2363_v1  ;;  %2391 = vmatpush.bf16.msra.mxu2 %v2382_v4 }
 0x83d   : > { %v2344_v6 = vsel %vm1427_vm3, %v2149_v5, 0 }
 0x83e   : > { %2353 = vmatpush.bf16.msra.mxu0 %v2344_v6 }
 0x885   : > { %v2266_v7 = vpop.xlane.xlu0 %2265 }
 0x886   : > { %3240 = vrcp.f32 %v2266_v7  ;;  %v2287_v12 = vand.u32 2147483648, %v2266_v7  ;;  %v2285_v17 = vand.u32 2147483647, %v2266_v7  ;;  %vm2281_vm15 = vweird.f32 %v2266_v7 }
 0x888   : > { %v2288_v23 = vor.u32 1.1754944e-38, %v2287_v12  ;;  %vm2286_vm3 = vcmp.eq.f32.partialorder %v2285_v17, 8.507059e+37 }
 0x88a   : > { %v2272_v8 = vpop.xlane.xlu1 %2271 }
 0x88b   : > { %3242 = vrcp.f32 %v2272_v8  ;;  %v2317_v26 = vand.u32 2147483648, %v2272_v8  ;;  %v2315_v29 = vand.u32 2147483647, %v2272_v8  ;;  %vm2311_vm6 = vweird.f32 %v2272_v8 }
 0x88c   : > { %v3241_v10 = vpop.eup %3240 }
 0x88d   : > { %v2277_v13 = vmul.f32 %v3241_v10, %v2266_v7  ;;  %vm2282_vm14 = vweird.f32 %v3241_v10  ;;  %v2318_v33 = vor.u32 1.1754944e-38, %v2317_v26  ;;  %vm2316_vm10 = vcmp.eq.f32.partialorder %v2315_v29, 8.507059e+37 }
 0x88e   : > { %vm2283_vm4 = vmor %vm2281_vm15, %vm2282_vm14 }
 0x88f   : > { %v2278_v11 = vsub.f32 1.0, %v2277_v13 }
 0x891   : > { %v3243_v9 = vpop.eup %3242  ;;  %v2279_v15 = vmul.f32 %v3241_v10, %v2278_v11 }
 0x892   : > { %v2307_v18 = vmul.f32 %v3243_v9, %v2272_v8  ;;  %v2275_v21 = vpop.xlane.xlu1 %2274  ;;  %vm2312_vm5 = vweird.f32 %v3243_v9 }
 0x893   : > { %v2280_v22 = vadd.f32 %v3241_v10, %v2279_v15  ;;  %3244 = vrcp.f32 %v2275_v21  ;;  %vm2313_vm7 = vmor %vm2311_vm6, %vm2312_vm5  ;;  %v2330_v16 = vand.u32 2147483647, %v2275_v21  ;;  %vm2326_vm12 = vweird.f32 %v2275_v21 }
 0x894   : > { %v2308_v24 = vsub.f32 1.0, %v2307_v18 }
 0x895   : > { %v2284_v25 = vsel %vm2283_vm4, %v3241_v10, %v2280_v22  ;;  %vm2331_vm14 = vcmp.eq.f32.partialorder %v2330_v16, 8.507059e+37 }
 0x896   : > { %v2289_v27 = vsel %vm2286_vm3, %v2288_v23, %v2284_v25  ;;  %v2309_v28 = vmul.f32 %v3243_v9, %v2308_v24 }
 0x897   : > { %v2290_v20 = vmul.f32 %v3935_v42, %v2289_v27  ;;  %v2332_v42 = vand.u32 2147483648, %v2275_v21 }
 0x898   : > { %v2310_v30 = vadd.f32 %v3243_v9, %v2309_v28 }
 0x899   : > { %v3245_v32 = vpop.eup %3244  ;;  %v2336_v35 = vpack.c.bf16 %v2290_v20, %v2290_v20  ;;  %v2543_v14 = vrot.slane %v2290_v20, 4  ;;  %v2333_v52 = vor.u32 1.1754944e-38, %v2332_v42 }
 0x89a   : > { %v2314_v38 = vsel %vm2313_vm7, %v3243_v9, %v2310_v30  ;;  %v2322_v39 = vmul.f32 %v3245_v32, %v2275_v21  ;;  %v2269_v40 = vpop.xlane.xlu1 %2268  ;;  %vm2327_vm11 = vweird.f32 %v3245_v32 }
 0x89b   : > { %v2319_v41 = vsel %vm2316_vm10, %v2318_v33, %v2314_v38  ;;  %3246 = vrcp.f32 %v2269_v40  ;;  %3059 = vmatmul.msk.bf16.vlgmr.msra.gmra.mxu0 %vm1239_vm2, %v2336_v35  ;;  %vm2328_vm13 = vmor %vm2326_vm12, %vm2327_vm11  ;;  %v2302_v57 = vand.u32 2147483648, %v2269_v40  ;;  %v2300_v59 = vand.u32 2147483647, %v2269_v40 }
 0x89c   : > { %v2320_v36 = vmul.f32 %v3939_v44, %v2319_v41  ;;  %v2323_v43 = vsub.f32 1.0, %v2322_v39  ;;  %vm2296_vm4 = vweird.f32 %v2269_v40  ;;  %vm2812_vm10 = vcmask 523264  }
 0x89d   : > { %v2303_v62 = vor.u32 1.1754944e-38, %v2302_v57  ;;  %vm2301_vm5 = vcmp.eq.f32.partialorder %v2300_v59, 8.507059e+37 }
 0x89e   : > { %v2541_v45 = vrot.slane %v2320_v36, 4  ;;  %v2544_v46 = vsel %vm873_vm1, %v2320_v36, %v2543_v14  ;;  %v2324_v37 = vmul.f32 %v3245_v32, %v2323_v43  ;;  %v2338_v48 = vpack.c.bf16 %v2320_v36, %v2320_v36 }
 0x89f   : > { %v2552_v5 = vperm.slane %v2544_v46, %v3543_v19 }
 0x8a0   : > { %v2542_v49 = vsel %vm873_vm1, %v2541_v45, %v2290_v20  ;;  %v2325_v50 = vadd.f32 %v3245_v32, %v2324_v37  ;;  %3061 = vmatmul.msk.bf16.vlgmr.msra.gmra.mxu2 %vm1239_vm2, %v2338_v48 }
 0x8a1   : > { %v3247_v51 = vpop.eup %3246  ;;  %v2548_v0 = vperm.slane %v2542_v49, %v3543_v19  ;;  %v2579_v12 = vrot.slane %v2552_v5, 4 }
 0x8a2   : > { %v2329_v53 = vsel %vm2328_vm13, %v3245_v32, %v2325_v50  ;;  %v2292_v44 = vmul.f32 %v3247_v51, %v2269_v40  ;;  %vm2297_vm15 = vweird.f32 %v3247_v51 }
 0x8a3   : > { %v2334_v54 = vsel %vm2331_vm14, %v2333_v52, %v2329_v53  ;;  %vm2298_vm3 = vmor %vm2296_vm4, %vm2297_vm15  ;;  %v2567_v10 = vrot.slane %v2548_v0, 4 }
 0x8a4   : > { %v2335_v55 = vmul.f32 %v3943_v47, %v2334_v54  ;;  %v2293_v56 = vsub.f32 1.0, %v2292_v44 }
 0x8a6   : > { %v2294_v58 = vmul.f32 %v3247_v51, %v2293_v56  ;;  %v2339_v61 = vpack.c.bf16 %v2335_v55, %v2335_v55  ;;  %v2553_v4 = vrot.slane %v2335_v55, 4 }
 0x8a8   : > { %v2295_v2 = vadd.f32 %v3247_v51, %v2294_v58  ;;  %3062 = vmatmul.msk.bf16.vlgmr.msra.gmra.mxu3 %vm1239_vm2, %v2339_v61 }
 0x8aa   : > { %v2299_v63 = vsel %vm2298_vm3, %v3247_v51, %v2295_v2 }
 0x8ab   : > { %v2304_v1 = vsel %vm2301_vm5, %v2303_v62, %v2299_v63 }
 0x8ac   : > { %v2305_v47 = vmul.f32 %v3949_v60, %v2304_v1 }
 0x8ae   : > { %v2554_v6 = vsel %vm873_vm1, %v2553_v4, %v2305_v47  ;;  %v2555_v7 = vrot.slane %v2305_v47, 4  ;;  %v2337_v8 = vpack.c.bf16 %v2305_v47, %v2305_v47 }
 0x8af   : > { %v2560_v13 = vperm.slane %v2554_v6, %v3543_v19 }
 0x8b0   : > { %v2556_v11 = vsel %vm873_vm1, %v2335_v55, %v2555_v7  ;;  %3060 = vmatmul.msk.bf16.vlgmr.msra.gmra.mxu1 %vm1239_vm2, %v2337_v8 }
 0x8b1   : > { %v2564_v9 = vperm.slane %v2556_v11, %v3543_v19  ;;  %v2565_v15 = vrot.slane %v2560_v13, 4  ;;  %v2568_v17 = vsel %vm873_vm1, %v2560_v13, %v2567_v10 }
 0x8b2   : > { %v2576_v60 = vperm.slane %v2568_v17, %v3553_v34 }
 0x8b3   : > { %v2577_v18 = vrot.slane %v2564_v9, 4  ;;  %v2566_v21 = vsel %vm873_vm1, %v2565_v15, %v2548_v0  ;;  %v2580_v22 = vsel %vm873_vm1, %v2564_v9, %v2579_v12 }
 0x8b4   : > { %v2572_v23 = vperm.slane %v2566_v21, %v3553_v34  ;;  %v2588_v24 = vperm.slane %v2580_v22, %v3553_v34  ;;  %v2591_v25 = vrot.slane %v2576_v60, 4 }
 0x8b5   : > { %v2578_v26 = vsel %vm873_vm1, %v2577_v18, %v2552_v5 }
 0x8b6   : > { %v2584_v27 = vperm.slane %v2578_v26, %v3553_v34  ;;  %v2589_v28 = vrot.slane %v2572_v23, 4  ;;  %v2592_v29 = vsel %vm873_vm1, 0.0, %v2591_v25  ;;  %v2595_v20 = vrot.slane %v2588_v24, 4 }
 0x8b7   : > { %v2597_v30 = vsel %vm873_vm1, %v2591_v25, %v2572_v23  ;;  %v2602_v32 = vrot.slane %v2592_v29, 4 }
 0x8b8   : > { %v2590_v33 = vsel %vm873_vm1, 0.0, %v2589_v28  ;;  %v2593_v35 = vrot.slane %v2584_v27, 4  ;;  %v2596_v38 = vsel %vm873_vm1, 0.0, %v2595_v20  ;;  %v2601_v39 = vperm.slane %v2597_v30, %v3543_v19 }
 0x8b9   : > { %v2603_v40 = vsel %vm873_vm1, %v2602_v32, %v2590_v33  ;;  %v2608_v41 = vsel %vm873_vm1, %v2595_v20, %v2584_v27  ;;  %v2613_v14 = vrot.slane %v2596_v38, 4 }
 0x8ba   : > { %v2594_v36 = vsel %vm873_vm1, 0.0, %v2593_v35  ;;  %v2607_v43 = vperm.slane %v2603_v40, %v3543_v19  ;;  %v2612_v16 = vperm.slane %v2608_v41, %v3543_v19  ;;  %v2621_v42 = vrot.slane %v2601_v39, 4 }
 0x8bb   : > { %v2614_v45 = vsel %vm873_vm1, %v2613_v14, %v2594_v36 }
 0x8bc   : > { %v2618_v46 = vperm.slane %v2614_v45, %v3543_v19  ;;  %v2622_v37 = vsel %vm873_vm1, %v2607_v43, %v2621_v42  ;;  %v2633_v48 = vrot.slane %v2612_v16, 4  ;;  %v2619_v49 = vrot.slane %v2607_v43, 4 }
 0x8bd   : > { %v2630_v50 = vperm.slane %v2622_v37, %v3553_v34 }
 0x8be   : > { %v2634_v51 = vsel %vm873_vm1, %v2618_v46, %v2633_v48  ;;  %v2620_v52 = vsel %vm873_vm1, %v2619_v49, %v2601_v39  ;;  %v2631_v53 = vrot.slane %v2618_v46, 4 }
 0x8bf   : > { %v2642_v44 = vperm.slane %v2634_v51, %v3553_v34  ;;  %v2626_v54 = vperm.slane %v2620_v52, %v3553_v34  ;;  %v2649_v55 = vrot.slane %v2630_v50, 4 }
 0x8c0   : > { %v2632_v56 = vsel %vm873_vm1, %v2631_v53, %v2612_v16 }
 0x8c1   : > { %v2647_v57 = vrot.slane %v2642_v44, 4  ;;  %v2638_v58 = vperm.slane %v2632_v56, %v3553_v34  ;;  %v2645_v59 = vrot.slane %v2626_v54, 4  ;;  %v4040_v61 = vsel %vm873_vm1, %v2642_v44, %v2649_v55 }
 0x8c3   : > { %v4043_v2 = vsel %vm873_vm1, %v2647_v57, %v2630_v50  ;;  %v2643_v62 = vrot.slane %v2638_v58, 4  ;;  %v4046_v63 = vsel %vm873_vm1, %v2638_v58, %v2645_v59 }
 0x8c5   : > { %v4049_v0 = vsel %vm873_vm1, %v2643_v62, %v2626_v54 }
 0x918   : > { %v2355_v1 = vpop.f32.mrf.mxu0 }
 0x919   : > { %v2418_v6 = vrot.slane %v2355_v1, 4 }
 0x920   : > { %v2357_v4 = vpop.f32.mrf.mxu0 }
 0x923   : > { %v2393_v47 = vpop.f32.mrf.mxu2 }
 0x924   : > { %v2416_v5 = vrot.slane %v2393_v47, 4  ;;  %v2419_v8 = vsel %vm873_vm1, %v2393_v47, %v2418_v6 }
 0x925   : > { %v2427_v9 = vperm.slane %v2419_v8, %v3543_v19 }
 0x926   : > { %v2417_v7 = vsel %vm873_vm1, %v2416_v5, %v2355_v1 }
 0x927   : > { %v2423_v10 = vperm.slane %v2417_v7, %v3543_v19  ;;  %v2454_v23 = vrot.slane %v2427_v9, 4 }
 0x929   : > { %v2442_v18 = vrot.slane %v2423_v10, 4 }
 0x92b   : > { %v2412_v13 = vpop.f32.mrf.mxu3  ;;  %v2395_v11 = vpop.f32.mrf.mxu2 }
 0x92c   : > { %v2428_v12 = vrot.slane %v2412_v13, 4 }
 0x92d   : > { %v2374_v15 = vpop.f32.mrf.mxu1 }
 0x92e   : > { %v2429_v17 = vsel %vm873_vm1, %v2428_v12, %v2374_v15  ;;  %v2430_v60 = vrot.slane %v2374_v15, 4 }
 0x92f   : > { %v2435_v21 = vperm.slane %v2429_v17, %v3543_v19  ;;  %v3110_v17 = vld [vmem:[%s4215_s14] sm:$0xff] }
 0x930   : > { %v2431_v22 = vsel %vm873_vm1, %v2412_v13, %v2430_v60 }
 0x931   : > { %v2439_v24 = vperm.slane %v2431_v22, %v3543_v19  ;;  %v2440_v25 = vrot.slane %v2435_v21, 4  ;;  %v2443_v26 = vsel %vm873_vm1, %v2435_v21, %v2442_v18 }
 0x932   : > { %v2451_v27 = vperm.slane %v2443_v26, %v3553_v34  ;;  %v3205_v26 = vld [vmem:[%s4216_s15] ss:$0 sm:$0xff] }
 0x933   : > { %v2441_v28 = vsel %vm873_vm1, %v2440_v25, %v2423_v10  ;;  %v2452_v29 = vrot.slane %v2439_v24, 4  ;;  %v2455_v20 = vsel %vm873_vm1, %v2439_v24, %v2454_v23  ;;  %v2414_v30 = vpop.f32.mrf.mxu3 }
 0x934   : > { %v2447_v32 = vperm.slane %v2441_v28, %v3553_v34  ;;  %v2463_v33 = vperm.slane %v2455_v20, %v3553_v34  ;;  %v2466_v35 = vrot.slane %v2451_v27, 4 }
 0x935   : > { %v2453_v38 = vsel %vm873_vm1, %v2452_v29, %v2427_v9  ;;  %v2376_v39 = vpop.f32.mrf.mxu1 }
 0x936   : > { %v2459_v40 = vperm.slane %v2453_v38, %v3553_v34  ;;  %v2464_v41 = vrot.slane %v2447_v32, 4  ;;  %v2467_v14 = vsel %vm873_vm1, 0.0, %v2466_v35  ;;  %v2470_v36 = vrot.slane %v2463_v33, 4 }
 0x937   : > { %v2472_v43 = vsel %vm873_vm1, %v2466_v35, %v2447_v32  ;;  %v2477_v16 = vrot.slane %v2467_v14, 4 }
 0x938   : > { %v2465_v42 = vsel %vm873_vm1, 0.0, %v2464_v41  ;;  %v2468_v45 = vrot.slane %v2459_v40, 4  ;;  %v2471_v46 = vsel %vm873_vm1, 0.0, %v2470_v36  ;;  %v2476_v37 = vperm.slane %v2472_v43, %v3543_v19 }
 0x939   : > { %v2488_v48 = vrot.slane %v2471_v46, 4  ;;  %v2478_v49 = vsel %vm873_vm1, %v2477_v16, %v2465_v42  ;;  %v2483_v50 = vsel %vm873_vm1, %v2470_v36, %v2459_v40  ;;  %v3113_v40 = vld [vmem:[%s4219_s18 + $0x8] sm:$0xff]  ;;  %v3116_v36 = vld [vmem:[%s4221_s20 + $0x10] sm:$0xff] }
 0x93a   : > { %v2469_v51 = vsel %vm873_vm1, 0.0, %v2468_v45  ;;  %v2482_v52 = vperm.slane %v2478_v49, %v3543_v19  ;;  %v2487_v53 = vperm.slane %v2483_v50, %v3543_v19  ;;  %v2496_v44 = vrot.slane %v2476_v37, 4  ;;  %2767 = vmatpush.bf16.msrb.mxu1 %v3113_v40  ;;  %v3115_v16 = vld [vmem:[%s4221_s20 + $0x8] sm:$0xff]  ;;  %v3206_v50 = vld [vmem:[%s4217_s16] ss:$0 sm:$0xff] }
 0x93b   : > { %v2489_v54 = vsel %vm873_vm1, %v2488_v48, %v2469_v51 }
 0x93c   : > { %v2493_v55 = vperm.slane %v2489_v54, %v3543_v19  ;;  %v2508_v56 = vrot.slane %v2487_v53, 4  ;;  %v2494_v57 = vrot.slane %v2482_v52, 4  ;;  %v2497_v58 = vsel %vm873_vm1, %v2482_v52, %v2496_v44  ;;  %v3207_v52 = vld [vmem:[%s4218_s17] ss:$0 sm:$0xff] }
 0x93d   : > { %v2505_v6 = vperm.slane %v2497_v58, %v3553_v34 }
 0x93e   : > { %v2509_v59 = vsel %vm873_vm1, %v2493_v55, %v2508_v56  ;;  %v2495_v62 = vsel %vm873_vm1, %v2494_v57, %v2476_v37  ;;  %v2506_v1 = vrot.slane %v2493_v55, 4  ;;  %v3114_v56 = vld [vmem:[%s4221_s20] sm:$0xff] }
 0x93f   : > { %v2517_v4 = vperm.slane %v2509_v59, %v3553_v34  ;;  %v2501_v47 = vperm.slane %v2495_v62, %v3553_v34  ;;  %v2524_v9 = vrot.slane %v2505_v6, 4  ;;  %v3208_v57 = vld [vmem:[%s4220_s19] ss:$0 sm:$0xff] }
 0x940   : > { %v2507_v5 = vsel %vm873_vm1, %v2506_v1, %v2487_v53 }
 0x941   : > { %v2522_v7 = vrot.slane %v2517_v4, 4  ;;  %v2513_v19 = vperm.slane %v2507_v5, %v3553_v34  ;;  %v2520_v8 = vrot.slane %v2501_v47, 4  ;;  %v2525_v15 = vsel %vm873_vm1, %v2517_v4, %v2524_v9  ;;  %v3111_v34 = vld [vmem:[%s4215_s14 + $0x8] sm:$0xff] }
 0x942   : > { %2697 = vmatpush.bf16.msrb.mxu0 %v3111_v34 }
 0x943   : > { %v2523_v10 = vsel %vm873_vm1, %v2522_v7, %v2505_v6  ;;  %v2518_v13 = vrot.slane %v2513_v19, 4  ;;  %v2521_v11 = vsel %vm873_vm1, %v2513_v19, %v2520_v8 }
 0x944   : > { %2531 = vrot.lane.b32.xlu1 %v2523_v10, %s4285_s0  ;;  %2527 = vrot.lane.b32.xlu2 %v2521_v11, %s4286_s5 }
 0x945   : > { %v2519_v12 = vsel %vm873_vm1, %v2518_v13, %v2501_v47  ;;  %v3209_v47 = vld [vmem:[%s4222_s21] ss:$0 sm:$0xff] }
 0x946   : > { %2698 = vmatpush.bf16.msrb.mxu0 %v3110_v17 }
 0x94c   : > { %2535 = vrot.lane.b32.xlu2 %v2525_v15, %s4287_s3 }
 0x99e   : > { %v2528_v60 = vpop.permute.xlu2 %2527 }
 0x99f   : > { %v2538_v18 = vsel %vm1239_vm2, %v2519_v12, %v2528_v60 }
 0x9a6   : > { %v2536_v22 = vpop.permute.xlu2 %2535 }
 0x9b6   : > { %v2532_v21 = vpop.permute.xlu1 %2531 }
 0x9b7   : > { %v2539_v23 = vsel %vm1624_vm8, %v2538_v18, %v2532_v21 }
 0x9b8   : > { %v2540_v24 = vsel %vm1626_vm9, %v2539_v23, %v2536_v22 }
 0x9b9   : > { %v2667_v25 = vpack.c.bf16 %v2540_v24, %v2540_v24 }
 0x9bb   : > { %3071 = vmatmul.msk.bf16.vlgmr.msrb.gmra.mxu0 %vm844_vm0, %v2667_v25 }
 0xa38   : > { %v2700_v27 = vpop.f32.mrf.mxu0 }
 0xa39   : > { %v2701_v28 = vadd.f32 %v3205_v26, %v2700_v27 }
 0xa3b   : > { %v2704_v29 = vadd.f32 %v2701_v28, %v3808_v31  ;;  %v3112_v31 = vld [vmem:[%s4219_s18] sm:$0xff] }
 0xa3c   : > { %2768 = vmatpush.bf16.msrb.mxu1 %v3112_v31 }
 0xa3d   : > { %v2705_v20 = vsel %vm844_vm0, %v2704_v29, 0.0 }
 0xa3e   : > { %2706 = vadd.xlane.f32.xlu2 %v2705_v20  ;;  %v3211_v20 = vld [vmem:[%s4224_s23] ss:$0 sm:$0xff] }
 0xa40   : > { %v2702_v30 = vpop.f32.mrf.mxu0 }
 0xa56   : > { %2656 = vrot.lane.b32.xlu2 %v4043_v2, %s4285_s0  ;;  %v3117_v2 = vld [vmem:[%s4221_s20 + $0x18] sm:$0xff]  ;;  %s3099_s0 = sshll.u32 %s3478_s7, 3 }
 0xa57   : > { %2820 = vmatpush.bf16.msrb.mxu2 %v3117_v2  ;;  %s2878_s30 = scalar_lea.hbm %s4225_s24, %s3099_s0 }
 0xa58   : > { %s2882_s10 = sshll.u32 %s2878_s30, 4  ;;  %s2883_s10 = int_to_ptr.hbm [resolvable:$true] %s2882_s10 }
 0xa59   : > { %s3266_s1 = sshra.s32 %s2883_s10, 4  ;;  %s3267_s1 = int_to_ptr.hbm [resolvable:$true] %s3266_s1 }
 0xa5a   : > { %s3268_s0 = scalar_lea.hbm %s3267_s1, 8  ;;  %p3273_p0 = scmp.lt.s32.totalorder %s3267_s1, %s4225_s24 }
 0xa5b   : > { %2821 = vmatpush.bf16.msrb.mxu2 %v3116_v36  ;;  %p3269_p11 = scmp.ne.s32.totalorder %s3267_s1, %s3268_s0 }
 0xa5d   : > { %p3270_p12 = pnand %p3269_p11, %p3495_p5 }
 0xa5f   : > { %2822 = vmatpush.bf16.msrb.mxu2 %v3115_v16  ;;  %p3271_p13 = pneg %p3270_p12 }
 0xa63   : > { %2823 = vmatpush.bf16.msrb.mxu2 %v3114_v56 }
 0xab1   : > { %v2707_v32 = vpop.xlane.xlu2 %2706 }
 0xab2   : > { %v2708_v33 = vmul.f32 %v2707_v32, %v3780_v3 }
 0xab4   : > { %v2709_v35 = vsub.f32 %v2704_v29, %v2708_v33 }
 0xab6   : > { %v2710_v38 = vmul.f32 %v2709_v35, %v2709_v35 }
 0xab8   : > { %v2711_v39 = vsel %vm844_vm0, %v2710_v38, 0.0 }
 0xab9   : > { %2712 = vadd.xlane.f32.xlu1 %v2711_v39 }
 0xb2c   : > { %v2713_v41 = vpop.xlane.xlu1 %2712 }
 0xb2d   : > { %v2714_v14 = vmul.f32 %v2713_v41, %v3780_v3 }
 0xb2f   : > { %v2715_v43 = vadd.f32 1e-05, %v2714_v14 }
 0xb31   : > { %3248 = vrsqrt.f32 %v2715_v43  ;;  %vm2722_vm6 = vweird.f32 %v2715_v43 }
 0xb37   : > { %v3249_v42 = vpop.eup %3248 }
 0xb38   : > { %v2717_v45 = vmul.f32 %v3249_v42, %v2715_v43  ;;  %vm2723_vm1 = vweird.f32 %v3249_v42 }
 0xb39   : > { %vm2724_vm7 = vmor %vm2722_vm6, %vm2723_vm1 }
 0xb3a   : > { %v2718_v46 = vmul.f32 %v3249_v42, %v2717_v45 }
 0xb3c   : > { %v2719_v37 = vmul.f32 0.5, %v2718_v46 }
 0xb3e   : > { %v2720_v48 = vsub.f32 1.5, %v2719_v37 }
 0xb40   : > { %v2721_v49 = vmul.f32 %v3249_v42, %v2720_v48 }
 0xb42   : > { %v2725_v51 = vsel %vm2724_vm7, %v3249_v42, %v2721_v49 }
 0xb43   : > { %v2726_v53 = vmul.f32 %v2725_v51, %v2709_v35 }
 0xb45   : > { %v2731_v44 = vmul.f32 %v3206_v50, %v2726_v53 }
 0xb47   : > { %v2736_v54 = vadd.f32 %v3207_v52, %v2731_v44 }
 0xb49   : > { %v2737_v55 = vpack.c.bf16 %v2736_v54, %v2736_v54 }
 0xb4b   : > { %3080 = vmatmul.msk.bf16.vlgmr.msrb.gmra.mxu1 %vm844_vm0, %v2737_v55 }
 0xbc8   : > { %v2770_v58 = vpop.f32.mrf.mxu1 }
 0xbc9   : > { %v2771_v59 = vadd.f32 %v3208_v57, %v2770_v58 }
 0xbcb   : > { %v2774_v62 = vmax.f32 %v2771_v59, 0.0 }
 0xbcd   : > { %v2775_v1 = vpack.c.bf16 %v2774_v62, %v2774_v62 }
 0xbcf   : > { %3097 = vmatmul.msk.bf16.vlgmr.msrb.gmra.mxu2 %vm2812_vm10, %v2775_v1 }
 0xbd0   : > { %v2772_v4 = vpop.f32.mrf.mxu1 }
 0xc52   : > { %v2825_v5 = vpop.f32.mrf.mxu2 }
 0xc53   : > { %v2826_v6 = vadd.f32 %v3209_v47, %v2825_v5 }
 0xc55   : > { %v2829_v7 = vadd.f32 %v2826_v6, %v2736_v54 }
 0xc57   : > { %v2830_v19 = vsel %vm844_vm0, %v2829_v7, 0.0 }
 0xc58   : > { %2831 = vadd.xlane.f32.xlu0 %v2830_v19 }
 0xc5a   : > { %v2827_v8 = vpop.f32.mrf.mxu2 }
 0xc6c   : > { %2652 = vrot.lane.b32.xlu0 %v4046_v63, %s4286_s5  ;;  %s791_s5 = sand.u32 1, %s3306_s2  }
 0xccb   : > { %v2832_v10 = vpop.xlane.xlu0 %2831 }
 0xccc   : > { %v2833_v13 = vmul.f32 %v2832_v10, %v3780_v3 }
 0xcce   : > { %v2834_v11 = vsub.f32 %v2829_v7, %v2833_v13 }
 0xcd0   : > { %v2835_v12 = vmul.f32 %v2834_v11, %v2834_v11 }
 0xcd2   : > { %v2836_v9 = vsel %vm844_vm0, %v2835_v12, 0.0 }
 0xcd3   : > { %2837 = vadd.xlane.f32.xlu0 %v2836_v9 }
 0xcde   : > { %v2653_v15 = vpop.permute.xlu0 %2652 }
 0xcdf   : > { %v2663_v22 = vsel %vm1239_vm2, %v4049_v0, %v2653_v15  ;;  %v3210_v0 = vld [vmem:[%s4223_s22] ss:$0 sm:$0xff] }
 0xce7   : > { %2660 = vrot.lane.b32.xlu0 %v4040_v61, %s4287_s3  ;;  %v2657_v61 = vpop.permute.xlu2 %2656  ;;  %s3006_s3 = sshll.u32 %s791_s5, 3 }
 0xce8   : > { %v2664_v25 = vsel %vm1624_vm8, %v2663_v22, %v2657_v61  ;;  %s793_s28 = scalar_lea.vmem [#allocation2], %s3006_s3  ;;  %s3272_s3 = scalar_lea.hbm %s4225_s24, 16 }
 0xce9   : > { %s2880_s6 = sshll.u32 %s793_s28, 4  ;;  %p3274_p1 = scmp.lt.s32.totalorder %s3272_s3, %s3268_s0  ;;  %s2881_s6 = int_to_ptr.vmem [resolvable:$true] %s2880_s6 }
 0xceb   : > { %p3275_p2 = por %p3274_p1, %p3273_p0 }
 0xced   : > { %p3276_p3 = pnand %p3275_p2, %p3271_p13 }
 0xd46   : > { %v2838_v34 = vpop.xlane.xlu0 %2837 }
 0xd47   : > { %v2839_v17 = vmul.f32 %v2838_v34, %v3780_v3 }
 0xd49   : > { %v2840_v60 = vadd.f32 1e-05, %v2839_v17 }
 0xd4b   : > { %3250 = vrsqrt.f32 %v2840_v60  ;;  %vm2847_vm12 = vweird.f32 %v2840_v60 }
 0xd51   : > { %v3251_v63 = vpop.eup %3250 }
 0xd52   : > { %v2842_v18 = vmul.f32 %v3251_v63, %v2840_v60  ;;  %vm2848_vm11 = vweird.f32 %v3251_v63 }
 0xd53   : > { %vm2849_vm13 = vmor %vm2847_vm12, %vm2848_vm11 }
 0xd54   : > { %v2843_v21 = vmul.f32 %v3251_v63, %v2842_v18 }
 0xd56   : > { %v2844_v23 = vmul.f32 0.5, %v2843_v21 }
 0xd58   : > { %v2845_v24 = vsub.f32 1.5, %v2844_v23 }
 0xd59   : > { %v2661_v3 = vpop.permute.xlu0 %2660 }
 0xd5a   : > { %v2846_v26 = vmul.f32 %v3251_v63, %v2845_v24  ;;  %v2665_v27 = vsel %vm1626_vm9, %v2664_v25, %v2661_v3 }
 0xd5b   : > { %2666 = vst.msk [vmem:[%s818_s26] sm:$0xff] %vm844_vm0, %v2665_v27  ;;  %s2864_s26 = scalar_lea.sflag [#allocation3], %s791_s5 }
 0xd5c   : > { %v2850_v28 = vsel %vm2849_vm13, %v3251_v63, %v2846_v26 }
 0xd5d   : > { %v2851_v29 = vmul.f32 %v2850_v28, %v2834_v11 }
 0xd5f   : > { %v2856_v30 = vmul.f32 %v3210_v0, %v2851_v29 }
 0xd61   : > { %v2861_v32 = vadd.f32 %v3211_v20, %v2856_v30 }
 0xd63   : > { %2862 = vst.msk [vmem:[%s793_s28] sm:$0xff] %vm844_vm0, %v2861_v32 }
 0xd64   : > { %3279 = shalt.err (!%p3276_p3)
}
 0xd65   : > { %3118 = dma.vmem_to_hbm [thread:$0]  (%p3495_p5), %s2881_s6, 128, %s2883_s10, %s2864_s26  }
 0xd66 PF: > { %s4288_s5 = sld [smem:[#allocation7_spill]] }
 0xd67   : > { %s4289_s7 = sld [smem:[#allocation5_spill]] }
 0xd6c   : > { %p3124_p4 = scmp.ge.s32.totalorder %s4288_s5, 2 }
 0xd6d   : > { %s2897_s28 = sand.u32 1, %s4289_s7  }
 0xd6e   : > { %p3121_p7 = pnand %p3124_p4, %p3499_p6  ;;  %s2898_s9 = scalar_lea.sflag [#allocation3], %s2897_s28 }
 0xd70   : > { %p3122_p8 = pneg %p3121_p7 }
 0xd72   : > { %3297 = dma.done.wait (%p3122_p8), %s2898_s9, 128  }
 0xd73   : > { %3299 = vsyncadd (%p3122_p8), %s2898_s9, 4294967168  ;;  %s4291_s30 = sld [smem:[#allocation8_spill]]  ;;  %s4294_s29 = smov %s3306_s2 }
 0xd74   : > { %s4292_s1 = sld [smem:[#allocation6_spill]] }
 0xd75   : > { %s4293_s6 = sld [smem:[#allocation9_spill]] }
 0xd79   : > { %p36_p9 = scmp.ge.s32.totalorder %s4291_s30, 4  }
 0xd7a   : > { %s4295_s2 = smov %s4292_s1 }
 0xd7b   :  { %38 = sbr.rel (!%p36_p9) target bundleno = 15 (0xf), region = 172 }
 0xd80   :  { %2911 = vsyncpa [#allocation3], 1 }
 0xd81   :  { %2913 = vsyncpa [#allocation3 + $0x1], 1 }

</bundles_post_ra>
